<compile_context>
chip_gen: v7x
topology: tpu7x:2x2x1
jax: 0.10.0
libtpu: 0.0.40
codegen_flags: <defaults>
</compile_context>

<pallas_src>
import functools

import numpy as np
import jax
import jax.numpy as jnp
from jax.experimental import pallas as pl
from jax.experimental.pallas import tpu as pltpu

BN_EPS = 1e-3  # nn.BatchNorm2d(eps=0.001)


# ---------------------- precomputed spatial operators ------------------------
def _pool_matrix(H, W, k, stride):
    """(H*W, P*Q) matrix M with pooled = x(C, H*W) @ M  == avg_pool2d(k, stride)."""
    P = (H - k) // stride + 1
    Q = (W - k) // stride + 1
    M = np.zeros((H * W, P * Q), np.float32)
    inv = 1.0 / (k * k)
    for p in range(P):
        for q in range(Q):
            for di in range(k):
                for dj in range(k):
                    M[(stride * p + di) * W + (stride * q + dj), p * Q + q] += inv
    return M


def _upsample_pad_matrices(P, Q, H, W):
    """Fold (zero-pad-by-1 before a 1x1 conv) + nearest-upsample into a matmul.

    up = a(C, P*Q) @ U + relu(bias)(C,1) * m(1, H*W)
    U routes interior cells; m marks destinations whose nearest source is a
    padded border cell (value relu(bias), i.e. conv(0)+bn+relu).
    Nearest indexing matches legacy F.upsample_nearest: src = dst * in // out.
    """
    U = np.zeros((P * Q, H * W), np.float32)
    m = np.zeros((1, H * W), np.float32)
    ph, pw = P + 2, Q + 2  # padded conv-output spatial size
    for h in range(H):
        sh = (h * ph) // H
        for w in range(W):
            sw = (w * pw) // W
            if 1 <= sh <= P and 1 <= sw <= Q:
                U[(sh - 1) * Q + (sw - 1), h * W + w] = 1.0
            else:
                m[0, h * W + w] = 1.0
    return U, m


def _conv3x3_s2_extract(H, W):
    """(9, H*W, P*Q) tap-extraction matrices for a 3x3 stride-2 VALID conv."""
    P = (H - 3) // 2 + 1
    Q = (W - 3) // 2 + 1
    E = np.zeros((9, H * W, P * Q), np.float32)
    for di in range(3):
        for dj in range(3):
            t = di * 3 + dj
            for p in range(P):
                for q in range(Q):
                    E[t, (2 * p + di) * W + (2 * q + dj), p * Q + q] = 1.0
    return E


def _pad_to(v, m):
    return ((v + m - 1) // m) * m


# ------------------------------ host wrapper ----------------------------------
def _fold_bn(w, gamma, beta, mean, var):
    scale = gamma / jnp.sqrt(var + BN_EPS)
    bias = beta - mean * scale
    w_f = (w * scale.reshape((-1,) + (1,) * (w.ndim - 1))).astype(jnp.float32)
    return w_f, bias.astype(jnp.float32)


def multiscale_forward(x_nchw, params):
    f32, bf16 = jnp.float32, jnp.bfloat16
    N, Cin, H, W = x_nchw.shape
    HW = H * W

    # ---- fold BN (inference mode) into weights / biases ----
    w1, b1 = _fold_bn(*params["b1"])
    w2, b2 = _fold_bn(*params["b2"])
    w3, b3 = _fold_bn(*params["b3"])
    wf, bf = _fold_bn(*params["final"])
    C1, C2, C3, Cout = w1.shape[0], w2.shape[0], w3.shape[0], wf.shape[0]
    Ccat = C1 + C2 + C3
    w1 = w1.reshape(C1, Cin)
    w2 = w2.reshape(C2, Cin)
    w3 = w3.reshape(C3, Cin)

    # ---- spatial sizes ----
    P1, Q1 = (H - 3) // 4 + 1, (W - 3) // 4 + 1
    P2, Q2 = (H - 3) // 2 + 1, (W - 3) // 2 + 1
    Pf, Qf = (H - 3) // 2 + 1, (W - 3) // 2 + 1
    PQ1, PQ2, PQf = P1 * Q1, P2 * Q2, Pf * Qf

    # ---- merged spatial operator: [avgpool_s4 | avgpool_s2 | identity] ----
    # Each block starts on a 128-lane boundary so in-kernel slices stay aligned.
    off2 = _pad_to(PQ1, 128)
    off3 = off2 + _pad_to(PQ2, 128)
    S = np.zeros((HW, off3 + HW), np.float32)
    S[:, :PQ1] = _pool_matrix(H, W, 3, 4)
    S[:, off2:off2 + PQ2] = _pool_matrix(H, W, 3, 2)
    S[:, off3:off3 + HW] = np.eye(HW, dtype=np.float32)

    # ---- upsample interiors (stacked, sublane-tile aligned) ----
    U1, m1 = _upsample_pad_matrices(P1, Q1, H, W)
    U2, m2 = _upsample_pad_matrices(P2, Q2, H, W)
    u2off = _pad_to(PQ1, 16)
    UU = np.zeros((u2off + PQ2, HW), np.float32)
    UU[:PQ1] = U1
    UU[u2off:u2off + PQ2] = U2

    # ---- 3x3/s2 tap extractors, vertically stacked ----
    E = _conv3x3_s2_extract(H, W)                       # (9, HW, PQf)
    EV = E.reshape(9 * HW, PQf)

    # ---- branch conv weights: block-diag over the batch, stacked ----
    NC1, NC2, NC3, NCin, NCout = N * C1, N * C2, N * C3, N * Cin, N * Cout
    r2 = _pad_to(NC1, 16)
    r3 = r2 + _pad_to(NC2, 16)
    rows = r3 + NC3
    eyeN = jnp.eye(N, dtype=f32)
    W_all = jnp.zeros((rows, NCin), f32)
    W_all = W_all.at[:NC1].set(jnp.kron(eyeN, w1))
    W_all = W_all.at[r2:r2 + NC2].set(jnp.kron(eyeN, w2))
    W_all = W_all.at[r3:r3 + NC3].set(jnp.kron(eyeN, w3))
    BB = jnp.zeros((rows, 1), f32)
    BB = BB.at[:NC1, 0].set(jnp.tile(b1, N))
    BB = BB.at[r2:r2 + NC2, 0].set(jnp.tile(b2, N))
    BB = BB.at[r3:r3 + NC3, 0].set(jnp.tile(b3, N))

    # ---- final conv: per-tap channel-mix weights over the batched concat ----
    wf_taps = jnp.transpose(wf, (2, 3, 0, 1)).reshape(9, Cout, Ccat)   # t = di*3+dj
    cat_of_col = np.concatenate([np.tile(np.arange(C1), N),
                                 C1 + np.tile(np.arange(C2), N),
                                 C1 + C2 + np.tile(np.arange(C3), N)])
    img_of_col = np.concatenate([np.repeat(np.arange(N), C1),
                                 np.repeat(np.arange(N), C2),
                                 np.repeat(np.arange(N), C3)])
    img_mask = jnp.asarray(
        (img_of_col[None, :] == np.arange(N)[:, None]).astype(np.float32))
    WF_rows = (wf_taps[:, :, cat_of_col][:, None, :, :]
               * img_mask[None, :, None, :]).reshape(9 * NCout, N * Ccat)

    # ---- fold the zero-pad border of branches 1/2 through the final conv ----
    me1 = np.einsum('j,tjs->ts', m1[0], E)              # (9, PQf)
    me2 = np.einsum('j,tjs->ts', m2[0], E)
    w1b = jnp.einsum('toc,c->to', wf_taps[:, :, :C1], jnp.maximum(b1, 0.0))
    w2b = jnp.einsum('toc,c->to', wf_taps[:, :, C1:C1 + C2], jnp.maximum(b2, 0.0))
    border = (jnp.einsum('to,ts->os', w1b, jnp.asarray(me1))
              + jnp.einsum('to,ts->os', w2b, jnp.asarray(me2)))         # (Cout, PQf)
    BF = jnp.tile(bf[:, None] + border, (N, 1))                          # (N*Cout, PQf)

    # ------------------------------ Pallas kernel ------------------------------
    def kernel(x_ref, s_ref, w_ref, bb_ref, uu_ref, wfr_ref, ev_ref, bf_ref, o_ref):
        # 1) pooled slabs + x passthrough for both images, one matmul
        xs = jnp.dot(x_ref[...], s_ref[...], preferred_element_type=f32).astype(bf16)
        # 2) all three BN-folded 1x1 convs (block-diag over batch); f32 epilogue
        a = jnp.maximum(
            jnp.dot(w_ref[...], xs, preferred_element_type=f32) + bb_ref[...], 0.0)
        a1 = a[:NC1, :PQ1].astype(bf16)                       # (N*C1, PQ1)
        a2 = a[r2:r2 + NC2, off2:off2 + PQ2].astype(bf16)     # (N*C2, PQ2)
        a3 = a[r3:r3 + NC3, off3:off3 + HW].astype(bf16)      # (N*C3, HW)
        # 3/4) nearest-upsample interiors (pad border is folded into bf_ref)
        b1u = jnp.dot(a1, uu_ref[:PQ1, :], preferred_element_type=f32).astype(bf16)
        b2u = jnp.dot(a2, uu_ref[u2off:u2off + PQ2, :],
                      preferred_element_type=f32).astype(bf16)
        # channel concat of both images' branches — tiny, lives in VMEM
        b_cat = jnp.concatenate([b1u, b2u, a3], axis=0)        # (N*Ccat, HW)
        # 5) per-tap channel mix of the final 3x3/s2 conv (9 taps stacked)
        c = jnp.dot(wfr_ref[...], b_cat, preferred_element_type=f32)   # (9*N*Cout, HW)
        cw = jnp.concatenate(
            [c[NCout * t:NCout * (t + 1), :] for t in range(9)],
            axis=1).astype(bf16)                               # (N*Cout, 9*HW)
        # 6) spatial tap gather + (bias + folded border) + ReLU
        out = jnp.dot(cw, ev_ref[...], preferred_element_type=f32) + bf_ref[...]
        o_ref[...] = jnp.maximum(out, 0.0)

    vmem = pl.BlockSpec(memory_space=pltpu.MemorySpace.VMEM)
    out = pl.pallas_call(
        kernel,
        out_shape=jax.ShapeDtypeStruct((NCout, PQf), f32),
        in_specs=[vmem] * 8,
        out_specs=vmem,
    )(x_nchw.reshape(NCin, HW).astype(bf16),
      jnp.asarray(S, bf16),
      W_all.astype(bf16),
      BB,
      jnp.asarray(UU, bf16),
      WF_rows.astype(bf16),
      jnp.asarray(EV, bf16),
      BF)
    return out.reshape(N, Cout, Pf, Qf)


# ------------------------ deterministic parameter init -----------------------
def init_params(key, in_channels, out_channels):
    def conv_w(k, cout, cin, kh, kw):
        fan_in = cin * kh * kw
        return jax.random.normal(k, (cout, cin, kh, kw), jnp.float32) / np.sqrt(fan_in)

    def bn(k, c):
        k1, k2, k3, k4 = jax.random.split(k, 4)
        gamma = jax.random.uniform(k1, (c,), jnp.float32, 0.5, 1.5)
        beta = jax.random.normal(k2, (c,), jnp.float32) * 0.1
        mean = jax.random.normal(k3, (c,), jnp.float32) * 0.1
        var = jax.random.uniform(k4, (c,), jnp.float32, 0.5, 1.5)
        return gamma, beta, mean, var

    ks = jax.random.split(key, 8)
    oc = out_channels
    return {
        "b1": (conv_w(ks[0], oc // 2, in_channels, 1, 1),) + bn(ks[1], oc // 2),
        "b2": (conv_w(ks[2], oc, in_channels, 1, 1),) + bn(ks[3], oc),
        "b3": (conv_w(ks[4], oc * 2, in_channels, 1, 1),) + bn(ks[5], oc * 2),
        "final": (conv_w(ks[6], oc, oc * 7 // 2, 3, 3),) + bn(ks[7], oc),
    }


# ------------------------------ pure-JAX reference ---------------------------
def _ref_bcv(x, params, stride=1, padding=0):
    w, gamma, beta, mean, var = params
    y = jax.lax.conv_general_dilated(
        x, w, (stride, stride), [(padding, padding)] * 2,
        dimension_numbers=("NCHW", "OIHW", "NCHW"), precision="highest")
    scale = (gamma / jnp.sqrt(var + BN_EPS)).reshape(1, -1, 1, 1)
    bias = (beta - mean * gamma / jnp.sqrt(var + BN_EPS)).reshape(1, -1, 1, 1)
    return jnp.maximum(y * scale + bias, 0.0)


def _ref_pool(x, stride):
    s = jax.lax.reduce_window(x, 0.0, jax.lax.add,
                              (1, 1, 3, 3), (1, 1, stride, stride), "VALID")
    return s / 9.0


def _ref_up(x, H, W):
    ri = (np.arange(H) * x.shape[2]) // H
    ci = (np.arange(W) * x.shape[3]) // W
    return x[:, :, ri][:, :, :, ci]


def multiscale_reference(x, params):
    H, W = x.shape[2], x.shape[3]
    b1 = _ref_up(_ref_bcv(_ref_pool(x, 4), params["b1"], padding=1), H, W)
    b2 = _ref_up(_ref_bcv(_ref_pool(x, 2), params["b2"], padding=1), H, W)
    b3 = _ref_bcv(x, params["b3"])
    cat = jnp.concatenate([b1, b2, b3], axis=1)
    return _ref_bcv(cat, params["final"], stride=2, padding=0)


# ----------------------------------- main ------------------------------------
if __name__ == "__main__":
    key = jax.random.PRNGKey(0)
    kx, kp = jax.random.split(key)
    in_channels, out_channels = 4, 4
    x = jax.random.normal(kx, (2, in_channels, 16, 16), jnp.float32)  # NCHW
    params = init_params(kp, in_channels, out_channels)

    fwd = jax.jit(functools.partial(multiscale_forward, params=params))
    out = jax.block_until_ready(fwd(x))
    assert out.shape == (2, out_channels, 7, 7), out.shape

    ref = jax.block_until_ready(multiscale_reference(x, params))
    max_diff = float(np.max(np.abs(np.asarray(out, np.float32) - np.asarray(ref))))
    assert np.allclose(np.asarray(out, np.float32), np.asarray(ref),
                       atol=2e-2, rtol=2e-2), max_diff

    print("KERNEL_OK")
</pallas_src>

<mosaic_0001>
module attributes {stable_mosaic.version = 11 : i64} {
  func.func @kernel(%arg0: memref<8x256xbf16, #tpu.memory_space<vmem>>, %arg1: memref<256x512xbf16, #tpu.memory_space<vmem>>, %arg2: memref<48x8xbf16, #tpu.memory_space<vmem>>, %arg3: memref<48x1xf32, #tpu.memory_space<vmem>>, %arg4: memref<65x256xbf16, #tpu.memory_space<vmem>>, %arg5: memref<72x28xbf16, #tpu.memory_space<vmem>>, %arg6: memref<2304x49xbf16, #tpu.memory_space<vmem>>, %arg7: memref<8x49xf32, #tpu.memory_space<vmem>>, %arg8: memref<8x49xf32, #tpu.memory_space<vmem>>) attributes {dimension_semantics = [], scalar_prefetch = 0 : i64, scratch_operands = 0 : i64, tpu.core_type = #tpu.core_type<tc>} {
    %c0 = arith.constant 0 : index
    %c0_0 = arith.constant 0 : index
    %0 = vector.load %arg0[%c0, %c0_0] : memref<8x256xbf16, #tpu.memory_space<vmem>>, vector<8x256xbf16>
    %c0_1 = arith.constant 0 : index
    %c0_2 = arith.constant 0 : index
    %1 = vector.load %arg1[%c0_1, %c0_2] : memref<256x512xbf16, #tpu.memory_space<vmem>>, vector<256x512xbf16>
    %cst = arith.constant dense<0.000000e+00> : vector<8x512xf32>
    %2 = tpu.matmul %0, %1, %cst {dimension_numbers = #tpu.dot_dimension_numbers<[1], [0], [0], [1], [0, 0, 1, 1], [], []>} : vector<8x256xbf16>, vector<256x512xbf16>, vector<8x512xf32> -> vector<8x512xf32>
    %3 = arith.truncf %2 : vector<8x512xf32> to vector<8x512xbf16>
    %c0_3 = arith.constant 0 : index
    %c0_4 = arith.constant 0 : index
    %4 = vector.load %arg2[%c0_3, %c0_4] : memref<48x8xbf16, #tpu.memory_space<vmem>>, vector<48x8xbf16>
    %cst_5 = arith.constant dense<0.000000e+00> : vector<48x512xf32>
    %5 = tpu.matmul %4, %3, %cst_5 {dimension_numbers = #tpu.dot_dimension_numbers<[1], [0], [0], [1], [0, 0, 1, 1], [], []>} : vector<48x8xbf16>, vector<8x512xbf16>, vector<48x512xf32> -> vector<48x512xf32>
    %c0_6 = arith.constant 0 : index
    %c0_7 = arith.constant 0 : index
    %6 = vector.load %arg3[%c0_6, %c0_7] : memref<48x1xf32, #tpu.memory_space<vmem>>, vector<48x1xf32>
    %7 = vector.broadcast %6 : vector<48x1xf32> to vector<48x512xf32>
    %8 = arith.addf %5, %7 : vector<48x512xf32>
    %cst_8 = arith.constant 0.000000e+00 : f32
    %9 = vector.broadcast %cst_8 : f32 to vector<48x512xf32>
    %10 = arith.maximumf %8, %9 : vector<48x512xf32>
    %11 = vector.extract_strided_slice %10 {offsets = [0, 0], sizes = [4, 16], strides = [1, 1]} : vector<48x512xf32> to vector<4x16xf32>
    %12 = arith.truncf %11 : vector<4x16xf32> to vector<4x16xbf16>
    %13 = vector.extract_strided_slice %10 {offsets = [16, 128], sizes = [8, 49], strides = [1, 1]} : vector<48x512xf32> to vector<8x49xf32>
    %14 = arith.truncf %13 : vector<8x49xf32> to vector<8x49xbf16>
    %15 = vector.extract_strided_slice %10 {offsets = [32, 256], sizes = [16, 256], strides = [1, 1]} : vector<48x512xf32> to vector<16x256xf32>
    %16 = arith.truncf %15 : vector<16x256xf32> to vector<16x256xbf16>
    %c0_9 = arith.constant 0 : index
    %c0_10 = arith.constant 0 : index
    %17 = vector.load %arg4[%c0_9, %c0_10] : memref<65x256xbf16, #tpu.memory_space<vmem>>, vector<16x256xbf16>
    %cst_11 = arith.constant dense<0.000000e+00> : vector<4x256xf32>
    %18 = tpu.matmul %12, %17, %cst_11 {dimension_numbers = #tpu.dot_dimension_numbers<[1], [0], [0], [1], [0, 0, 1, 1], [], []>} : vector<4x16xbf16>, vector<16x256xbf16>, vector<4x256xf32> -> vector<4x256xf32>
    %19 = arith.truncf %18 : vector<4x256xf32> to vector<4x256xbf16>
    %c16 = arith.constant 16 : index
    %c0_12 = arith.constant 0 : index
    %20 = vector.load %arg4[%c16, %c0_12] : memref<65x256xbf16, #tpu.memory_space<vmem>>, vector<49x256xbf16>
    %cst_13 = arith.constant dense<0.000000e+00> : vector<8x256xf32>
    %21 = tpu.matmul %14, %20, %cst_13 {dimension_numbers = #tpu.dot_dimension_numbers<[1], [0], [0], [1], [0, 0, 1, 1], [], []>} : vector<8x49xbf16>, vector<49x256xbf16>, vector<8x256xf32> -> vector<8x256xf32>
    %22 = arith.truncf %21 : vector<8x256xf32> to vector<8x256xbf16>
    %23 = tpu.concatenate %19, %22, %16 in 0 : vector<4x256xbf16>, vector<8x256xbf16>, vector<16x256xbf16> -> vector<28x256xbf16>
    %c0_14 = arith.constant 0 : index
    %c0_15 = arith.constant 0 : index
    %24 = vector.load %arg5[%c0_14, %c0_15] : memref<72x28xbf16, #tpu.memory_space<vmem>>, vector<72x28xbf16>
    %cst_16 = arith.constant dense<0.000000e+00> : vector<72x256xf32>
    %25 = tpu.matmul %24, %23, %cst_16 {dimension_numbers = #tpu.dot_dimension_numbers<[1], [0], [0], [1], [0, 0, 1, 1], [], []>} : vector<72x28xbf16>, vector<28x256xbf16>, vector<72x256xf32> -> vector<72x256xf32>
    %26 = vector.extract_strided_slice %25 {offsets = [0, 0], sizes = [8, 256], strides = [1, 1]} : vector<72x256xf32> to vector<8x256xf32>
    %27 = vector.extract_strided_slice %25 {offsets = [8, 0], sizes = [8, 256], strides = [1, 1]} : vector<72x256xf32> to vector<8x256xf32>
    %28 = vector.extract_strided_slice %25 {offsets = [16, 0], sizes = [8, 256], strides = [1, 1]} : vector<72x256xf32> to vector<8x256xf32>
    %29 = vector.extract_strided_slice %25 {offsets = [24, 0], sizes = [8, 256], strides = [1, 1]} : vector<72x256xf32> to vector<8x256xf32>
    %30 = vector.extract_strided_slice %25 {offsets = [32, 0], sizes = [8, 256], strides = [1, 1]} : vector<72x256xf32> to vector<8x256xf32>
    %31 = vector.extract_strided_slice %25 {offsets = [40, 0], sizes = [8, 256], strides = [1, 1]} : vector<72x256xf32> to vector<8x256xf32>
    %32 = vector.extract_strided_slice %25 {offsets = [48, 0], sizes = [8, 256], strides = [1, 1]} : vector<72x256xf32> to vector<8x256xf32>
    %33 = vector.extract_strided_slice %25 {offsets = [56, 0], sizes = [8, 256], strides = [1, 1]} : vector<72x256xf32> to vector<8x256xf32>
    %34 = vector.extract_strided_slice %25 {offsets = [64, 0], sizes = [8, 256], strides = [1, 1]} : vector<72x256xf32> to vector<8x256xf32>
    %35 = tpu.concatenate %26, %27, %28, %29, %30, %31, %32, %33, %34 in 1 : vector<8x256xf32>, vector<8x256xf32>, vector<8x256xf32>, vector<8x256xf32>, vector<8x256xf32>, vector<8x256xf32>, vector<8x256xf32>, vector<8x256xf32>, vector<8x256xf32> -> vector<8x2304xf32>
    %36 = arith.truncf %35 : vector<8x2304xf32> to vector<8x2304xbf16>
    %c0_17 = arith.constant 0 : index
    %c0_18 = arith.constant 0 : index
    %37 = vector.load %arg6[%c0_17, %c0_18] : memref<2304x49xbf16, #tpu.memory_space<vmem>>, vector<2304x49xbf16>
    %cst_19 = arith.constant dense<0.000000e+00> : vector<8x49xf32>
    %38 = tpu.matmul %36, %37, %cst_19 {dimension_numbers = #tpu.dot_dimension_numbers<[1], [0], [0], [1], [0, 0, 1, 1], [], []>} : vector<8x2304xbf16>, vector<2304x49xbf16>, vector<8x49xf32> -> vector<8x49xf32>
    %c0_20 = arith.constant 0 : index
    %c0_21 = arith.constant 0 : index
    %39 = vector.load %arg7[%c0_20, %c0_21] : memref<8x49xf32, #tpu.memory_space<vmem>>, vector<8x49xf32>
    %40 = arith.addf %38, %39 : vector<8x49xf32>
    %cst_22 = arith.constant 0.000000e+00 : f32
    %41 = vector.broadcast %cst_22 : f32 to vector<8x49xf32>
    %42 = arith.maximumf %40, %41 : vector<8x49xf32>
    %c0_23 = arith.constant 0 : index
    %c0_24 = arith.constant 0 : index
    %43 = vector.load %arg8[%c0_23, %c0_24] : memref<8x49xf32, #tpu.memory_space<vmem>>, vector<8x49xf32>
    tpu.vector_store %arg8[%c0_23, %c0_24], %42 {strides = array<i32>} : memref<8x49xf32, #tpu.memory_space<vmem>>, vector<8x49xf32>,
    return
  }
}

</mosaic_0001>

<bundles_post_ra>
// kernel: tile.19
= control target key start
LH: loop header
LB: loop body
LE: loop exit
PB: predicated region body
PF: predicated region fallthrough
CT: control target
= control target key end

     0   :  { %2 = vsyncpa [#allocation1], 0  ;;  %s44_s6 = smov [#allocation0]   ;;  %s70_s0 = inlined_call_operand.hbm [shape: f32[2], index: 0, kind: input, shape index: {}]   ;;  %s71_s1 = inlined_call_operand.vmem [shape: f32[2,2], index: 1, kind: output, shape index: {}]  }
   0x1   :  { %s9_s7 = sshll.u32 %s44_s6, 4  ;;  %s20_s10 = scalar_lea.hbm %s70_s0, 16  ;;  %s10_s7 = int_to_ptr.vmem [resolvable:$true] %s9_s7 }
   0x2   :  { %p21_p0 = scmp.ne.s32.totalorder %s70_s0, %s20_s10  ;;  %p24_p1 = scmp.lt.u32.totalorder %s20_s10, %s70_s0 }
   0x4   :  { %p26_p2 = pnand %p24_p1, %p21_p0 }
   0x6   :  { %29 = shalt.err (!%p26_p2)
}
   0x7   :  { %s30_s15 = scalar_lea.vmem %s10_s7, 16  ;;  %s34_s16 = scalar_lea.vmem %s10_s7, 32 }
   0x8   :  { %p31_p3 = scmp.ne.s32.totalorder %s10_s7, %s30_s15  ;;  %p35_p4 = scmp.lt.s32.totalorder %s10_s7, %s10_s7 }
   0x9   :  { %p36_p5 = scmp.lt.s32.totalorder %s34_s16, %s30_s15 }
   0xb   :  { %p37_p6 = por %p36_p5, %p35_p4 }
   0xd   :  { %p38_p7 = pnand %p37_p6, %p31_p3 }
   0xf   :  { %41 = shalt.err (!%p38_p7)
}
  0x10   :  { %12 = dma.hbm_to_vmem [thread:$0]  %s70_s0, 16, %s10_s7, [#allocation1]  }
  0x11   :  { %42 = dma.done.wait [#allocation1], 16  }
  0x12   :  { %43 = vsyncadd [#allocation1], 4294967280  ;;  %v16_v0 = vld [vmem:[#allocation0] ss:$0 sm:$0xff] }
  0x13   :  { %17 = vst [vmem:[%s71_s1] sm:$0x3] %v16_v0 }
  0x14   :  { %18 = vsyncpa [#allocation1], 1 }

// kernel: tile.23
= control target key start
LH: loop header
LB: loop body
LE: loop exit
PB: predicated region body
PF: predicated region fallthrough
CT: control target
= control target key end

     0   :  { %2 = vsyncpa [#allocation1], 0  ;;  %s44_s6 = smov [#allocation0]   ;;  %s70_s0 = inlined_call_operand.hbm [shape: f32[4], index: 0, kind: input, shape index: {}]   ;;  %s71_s1 = inlined_call_operand.vmem [shape: f32[2,4], index: 1, kind: output, shape index: {}]  }
   0x1   :  { %s9_s7 = sshll.u32 %s44_s6, 4  ;;  %s20_s10 = scalar_lea.hbm %s70_s0, 16  ;;  %s10_s7 = int_to_ptr.vmem [resolvable:$true] %s9_s7 }
   0x2   :  { %p21_p0 = scmp.ne.s32.totalorder %s70_s0, %s20_s10  ;;  %p24_p1 = scmp.lt.u32.totalorder %s20_s10, %s70_s0 }
   0x4   :  { %p26_p2 = pnand %p24_p1, %p21_p0 }
   0x6   :  { %29 = shalt.err (!%p26_p2)
}
   0x7   :  { %s30_s15 = scalar_lea.vmem %s10_s7, 16  ;;  %s34_s16 = scalar_lea.vmem %s10_s7, 32 }
   0x8   :  { %p31_p3 = scmp.ne.s32.totalorder %s10_s7, %s30_s15  ;;  %p35_p4 = scmp.lt.s32.totalorder %s10_s7, %s10_s7 }
   0x9   :  { %p36_p5 = scmp.lt.s32.totalorder %s34_s16, %s30_s15 }
   0xb   :  { %p37_p6 = por %p36_p5, %p35_p4 }
   0xd   :  { %p38_p7 = pnand %p37_p6, %p31_p3 }
   0xf   :  { %41 = shalt.err (!%p38_p7)
}
  0x10   :  { %12 = dma.hbm_to_vmem [thread:$0]  %s70_s0, 16, %s10_s7, [#allocation1]  }
  0x11   :  { %42 = dma.done.wait [#allocation1], 16  }
  0x12   :  { %43 = vsyncadd [#allocation1], 4294967280  ;;  %v16_v0 = vld [vmem:[#allocation0] ss:$0 sm:$0xff] }
  0x13   :  { %17 = vst [vmem:[%s71_s1] sm:$0x3] %v16_v0 }
  0x14   :  { %18 = vsyncpa [#allocation1], 1 }

// kernel: tile.27
= control target key start
LH: loop header
LB: loop body
LE: loop exit
PB: predicated region body
PF: predicated region fallthrough
CT: control target
= control target key end

     0   :  { %2 = vsyncpa [#allocation1], 0  ;;  %s44_s6 = smov [#allocation0]   ;;  %s70_s0 = inlined_call_operand.hbm [shape: f32[8], index: 0, kind: input, shape index: {}]   ;;  %s71_s1 = inlined_call_operand.vmem [shape: f32[2,8], index: 1, kind: output, shape index: {}]  }
   0x1   :  { %s9_s7 = sshll.u32 %s44_s6, 4  ;;  %s20_s10 = scalar_lea.hbm %s70_s0, 16  ;;  %s10_s7 = int_to_ptr.vmem [resolvable:$true] %s9_s7 }
   0x2   :  { %p21_p0 = scmp.ne.s32.totalorder %s70_s0, %s20_s10  ;;  %p24_p1 = scmp.lt.u32.totalorder %s20_s10, %s70_s0 }
   0x4   :  { %p26_p2 = pnand %p24_p1, %p21_p0 }
   0x6   :  { %29 = shalt.err (!%p26_p2)
}
   0x7   :  { %s30_s15 = scalar_lea.vmem %s10_s7, 16  ;;  %s34_s16 = scalar_lea.vmem %s10_s7, 32 }
   0x8   :  { %p31_p3 = scmp.ne.s32.totalorder %s10_s7, %s30_s15  ;;  %p35_p4 = scmp.lt.s32.totalorder %s10_s7, %s10_s7 }
   0x9   :  { %p36_p5 = scmp.lt.s32.totalorder %s34_s16, %s30_s15 }
   0xb   :  { %p37_p6 = por %p36_p5, %p35_p4 }
   0xd   :  { %p38_p7 = pnand %p37_p6, %p31_p3 }
   0xf   :  { %41 = shalt.err (!%p38_p7)
}
  0x10   :  { %12 = dma.hbm_to_vmem [thread:$0]  %s70_s0, 16, %s10_s7, [#allocation1]  }
  0x11   :  { %42 = dma.done.wait [#allocation1], 16  }
  0x12   :  { %43 = vsyncadd [#allocation1], 4294967280  ;;  %v16_v0 = vld [vmem:[#allocation0] ss:$0 sm:$0xff] }
  0x13   :  { %17 = vst [vmem:[%s71_s1] sm:$0x3] %v16_v0 }
  0x14   :  { %18 = vsyncpa [#allocation1], 1 }

// kernel: multiscale_forward.1
= control target key start
LH: loop header
LB: loop body
LE: loop exit
PB: predicated region body
PF: predicated region fallthrough
CT: control target
= control target key end

     0   :  { %vm573_vm0 = vcmask 1043456   ;;  %vm563_vm1 = vcmask 64512   ;;  %vm809_vm2 = vcmask 1040384   ;;  %vm716_vm3 = vcmask 130048   ;;  %s4090_s1 = inlined_call_operand.vmem [shape: bf16[256,512], index: 1, kind: input, shape index: {}]   ;;  %s4091_s0 = inlined_call_operand.vmem [shape: bf16[8,256], index: 0, kind: input, shape index: {}]   ;;  %s4092_s2 = inlined_call_operand.vmem [shape: bf16[48,8], index: 2, kind: input, shape index: {}]   ;;  %s4093_s3 = inlined_call_operand.vmem [shape: f32[48,1], index: 3, kind: input, shape index: {}]   ;;  %s4094_s4 = inlined_call_operand.vmem [shape: bf16[65,256], index: 4, kind: input, shape index: {}]   ;;  %s4095_s5 = inlined_call_operand.vmem [shape: bf16[72,28], index: 5, kind: input, shape index: {}]   ;;  %s4096_s6 = inlined_call_operand.vmem [shape: bf16[2304,49], index: 6, kind: input, shape index: {}]   ;;  %s4097_s7 = inlined_call_operand.vmem [shape: f32[8,49], index: 7, kind: input, shape index: {}]   ;;  %s4098_s8 = inlined_call_operand.vmem [shape: f32[8,49], index: 8, kind: output, shape index: {}]  }
   0x1   :  { %v3000_v0 = vld [vmem:[%s4090_s1 + $0x4] ss:$16 sps:$4 sm:$0xff]   ;;  %v3002_v1 = vld [vmem:[%s4090_s1] ss:$16 sps:$4 sm:$0xff]   ;;  %v3050_v16 = vld [vmem:[%s4090_s1 + $0xc] ss:$16 sps:$4 sm:$0xff]  }
   0x2   :  { %422 = vmatprep.subr.bf16.mxu0 %v3000_v0  ;;  %v3003_v2 = vld [vmem:[%s4090_s1 + $0x24] ss:$16 sps:$4 sm:$0xff]   ;;  %v3005_v3 = vld [vmem:[%s4090_s1 + $0x20] ss:$16 sps:$4 sm:$0xff]   ;;  %v3052_v17 = vld [vmem:[%s4090_s1 + $0x8] ss:$16 sps:$4 sm:$0xff]   ;;  %463 = vmatprep.subr.bf16.mxu1 %v3050_v16 }
   0x3   :  { %423 = vmatpush1.bf16.msra.mxu0 %v3002_v1  ;;  %v3006_v4 = vld [vmem:[%s4090_s1 + $0x44] ss:$16 sps:$4 sm:$0xff]   ;;  %v3008_v5 = vld [vmem:[%s4090_s1 + $0x40] ss:$16 sps:$4 sm:$0xff]   ;;  %v3053_v18 = vld [vmem:[%s4090_s1 + $0x2c] ss:$16 sps:$4 sm:$0xff]   ;;  %464 = vmatpush1.bf16.msra.mxu1 %v3052_v17 }
   0x4   :  { %424 = vmatprep.subr.bf16.mxu0 %v3003_v2  ;;  %v3009_v6 = vld [vmem:[%s4090_s1 + $0x64] ss:$16 sps:$4 sm:$0xff]   ;;  %v3011_v7 = vld [vmem:[%s4090_s1 + $0x60] ss:$16 sps:$4 sm:$0xff]   ;;  %v3055_v21 = vld [vmem:[%s4090_s1 + $0x28] ss:$16 sps:$4 sm:$0xff]   ;;  %465 = vmatprep.subr.bf16.mxu1 %v3053_v18 }
   0x5   :  { %v3012_v8 = vld [vmem:[%s4090_s1 + $0x84] ss:$16 sps:$4 sm:$0xff]   ;;  %v3014_v9 = vld [vmem:[%s4090_s1 + $0x80] ss:$16 sps:$4 sm:$0xff]   ;;  %v3056_v22 = vld [vmem:[%s4090_s1 + $0x4c] ss:$16 sps:$4 sm:$0xff]  }
   0x6   :  { %v3015_v10 = vld [vmem:[%s4090_s1 + $0xa4] ss:$16 sps:$4 sm:$0xff]   ;;  %v3017_v11 = vld [vmem:[%s4090_s1 + $0xa0] ss:$16 sps:$4 sm:$0xff]   ;;  %v3058_v25 = vld [vmem:[%s4090_s1 + $0x48] ss:$16 sps:$4 sm:$0xff]  }
   0x7   :  { %425 = vmatpush1.bf16.msra.mxu0 %v3005_v3  ;;  %v3018_v12 = vld [vmem:[%s4090_s1 + $0xc4] ss:$16 sps:$4 sm:$0xff]   ;;  %v3020_v13 = vld [vmem:[%s4090_s1 + $0xc0] ss:$16 sps:$4 sm:$0xff]   ;;  %466 = vmatpush1.bf16.msra.mxu1 %v3055_v21  ;;  %v3059_v26 = vld [vmem:[%s4090_s1 + $0x6c] ss:$16 sps:$4 sm:$0xff]  }
   0x8   :  { %426 = vmatprep.subr.bf16.mxu0 %v3006_v4  ;;  %v3355_v14 = vld [vmem:[%s4091_s0] sm:$0xff]  ;;  %467 = vmatprep.subr.bf16.mxu1 %v3056_v22  ;;  %v3061_v29 = vld [vmem:[%s4090_s1 + $0x68] ss:$16 sps:$4 sm:$0xff]   ;;  %v3062_v30 = vld [vmem:[%s4090_s1 + $0x8c] ss:$16 sps:$4 sm:$0xff]   ;;  %v3264_v3 = vmov 0  }
   0x9   :  { %v2554_v15 = vcombine.high %v3355_v14, %v3355_v14  ;;  %v3021_v19 = vld [vmem:[%s4090_s1 + $0xe4] ss:$16 sps:$4 sm:$0xff]   ;;  %v3023_v20 = vld [vmem:[%s4090_s1 + $0xe0] ss:$16 sps:$4 sm:$0xff]   ;;  %v3064_v33 = vld [vmem:[%s4090_s1 + $0x88] ss:$16 sps:$4 sm:$0xff]   ;;  %v2553_v55 = vcombine.low %v3355_v14, %v3355_v14  ;;  %2998 = vset.pattern.permute.xlu0 %v3264_v3  ;;  %2999 = vset.pattern.permute.xlu1 %v3264_v3 }
   0xa   :  { %v3024_v23 = vld [vmem:[%s4090_s1 + $0x104] ss:$16 sps:$4 sm:$0xff]   ;;  %v3026_v24 = vld [vmem:[%s4090_s1 + $0x100] ss:$16 sps:$4 sm:$0xff]   ;;  %v3065_v34 = vld [vmem:[%s4090_s1 + $0xac] ss:$16 sps:$4 sm:$0xff]  }
   0xb   :  { %427 = vmatpush1.bf16.msra.mxu0 %v3008_v5  ;;  %454 = vmatprep.mubr.bf16.mxu0 %v2554_v15  ;;  %v3027_v27 = vld [vmem:[%s4090_s1 + $0x124] ss:$16 sps:$4 sm:$0xff]   ;;  %v3029_v28 = vld [vmem:[%s4090_s1 + $0x120] ss:$16 sps:$4 sm:$0xff]   ;;  %v3067_v36 = vld [vmem:[%s4090_s1 + $0xa8] ss:$16 sps:$4 sm:$0xff]  }
   0xc   :  { %428 = vmatprep.subr.bf16.mxu0 %v3009_v6  ;;  %495 = vmatprep.mubr.bf16.mxu1 %v2554_v15  ;;  %v3030_v31 = vld [vmem:[%s4090_s1 + $0x144] ss:$16 sps:$4 sm:$0xff]   ;;  %v3032_v32 = vld [vmem:[%s4090_s1 + $0x140] ss:$16 sps:$4 sm:$0xff]   ;;  %v3068_v38 = vld [vmem:[%s4090_s1 + $0xcc] ss:$16 sps:$4 sm:$0xff]  }
   0xd   :  { %468 = vmatpush1.bf16.msra.mxu1 %v3058_v25  ;;  %v3033_v35 = vld [vmem:[%s4090_s1 + $0x164] ss:$16 sps:$4 sm:$0xff]   ;;  %v3035_v37 = vld [vmem:[%s4090_s1 + $0x160] ss:$16 sps:$4 sm:$0xff]   ;;  %v3070_v40 = vld [vmem:[%s4090_s1 + $0xc8] ss:$16 sps:$4 sm:$0xff]  }
   0xe   :  { %469 = vmatprep.subr.bf16.mxu1 %v3059_v26  ;;  %v3036_v39 = vld [vmem:[%s4090_s1 + $0x184] ss:$16 sps:$4 sm:$0xff]   ;;  %v3038_v41 = vld [vmem:[%s4090_s1 + $0x180] ss:$16 sps:$4 sm:$0xff]   ;;  %v3071_v42 = vld [vmem:[%s4090_s1 + $0xec] ss:$16 sps:$4 sm:$0xff]  }
   0xf   :  { %429 = vmatpush1.bf16.msra.mxu0 %v3011_v7  ;;  %v3039_v43 = vld [vmem:[%s4090_s1 + $0x1a4] ss:$16 sps:$4 sm:$0xff]   ;;  %v3073_v44 = vld [vmem:[%s4090_s1 + $0xe8] ss:$16 sps:$4 sm:$0xff]   ;;  %v3041_v45 = vld [vmem:[%s4090_s1 + $0x1a0] ss:$16 sps:$4 sm:$0xff]  }
  0x10   :  { %430 = vmatprep.subr.bf16.mxu0 %v3012_v8  ;;  %v3074_v46 = vld [vmem:[%s4090_s1 + $0x10c] ss:$16 sps:$4 sm:$0xff]   ;;  %v3042_v47 = vld [vmem:[%s4090_s1 + $0x1c4] ss:$16 sps:$4 sm:$0xff]   ;;  %v3076_v48 = vld [vmem:[%s4090_s1 + $0x108] ss:$16 sps:$4 sm:$0xff]  }
  0x11   :  { %470 = vmatpush1.bf16.msra.mxu1 %v3061_v29  ;;  %v3044_v49 = vld [vmem:[%s4090_s1 + $0x1c0] ss:$16 sps:$4 sm:$0xff]   ;;  %v3077_v50 = vld [vmem:[%s4090_s1 + $0x12c] ss:$16 sps:$4 sm:$0xff]   ;;  %v3045_v51 = vld [vmem:[%s4090_s1 + $0x1e4] ss:$16 sps:$4 sm:$0xff]  }
  0x12   :  { %471 = vmatprep.subr.bf16.mxu1 %v3062_v30  ;;  %v3079_v52 = vld [vmem:[%s4090_s1 + $0x128] ss:$16 sps:$4 sm:$0xff]   ;;  %v3047_v53 = vld [vmem:[%s4090_s1 + $0x1e0] ss:$16 sps:$4 sm:$0xff]   ;;  %v3080_v54 = vld [vmem:[%s4090_s1 + $0x14c] ss:$16 sps:$4 sm:$0xff]  }
  0x13   :  { %431 = vmatpush1.bf16.msra.mxu0 %v3014_v9  ;;  %v3082_v56 = vld [vmem:[%s4090_s1 + $0x148] ss:$16 sps:$4 sm:$0xff]   ;;  %v3083_v57 = vld [vmem:[%s4090_s1 + $0x16c] ss:$16 sps:$4 sm:$0xff]   ;;  %v516_v4 = vld [vmem:[%s4093_s3 + $0x10] sm:$0xff]  ;;  %vm805_vm4 = vcmask 400384  }
  0x14   :  { %432 = vmatprep.subr.bf16.mxu0 %v3015_v10  ;;  %v3085_v58 = vld [vmem:[%s4090_s1 + $0x168] ss:$16 sps:$4 sm:$0xff]   ;;  %v3086_v59 = vld [vmem:[%s4090_s1 + $0x18c] ss:$16 sps:$4 sm:$0xff]   ;;  %531 = vperm.xlu0 %2998, %v516_v4   ;;  %v514_v5 = vld [vmem:[%s4093_s3] sm:$0xff]  ;;  %vm876_vm5 = vcmask 1045504  }
  0x15   :  { %472 = vmatpush1.bf16.msra.mxu1 %v3064_v33  ;;  %v3088_v60 = vld [vmem:[%s4090_s1 + $0x188] ss:$16 sps:$4 sm:$0xff]   ;;  %v3089_v61 = vld [vmem:[%s4090_s1 + $0x1ac] ss:$16 sps:$4 sm:$0xff]   ;;  %v3100_v15 = vld [vmem:[%s4092_s2 + $0x10] sm:$0xff]   ;;  %vm869_vm6 = vcmask 1041408  }
  0x16   :  { %473 = vmatprep.subr.bf16.mxu1 %v3065_v34  ;;  %v3091_v62 = vld [vmem:[%s4090_s1 + $0x1a8] ss:$16 sps:$4 sm:$0xff]   ;;  %v3092_v63 = vld [vmem:[%s4090_s1 + $0x1cc] ss:$16 sps:$4 sm:$0xff]   ;;  %v811_v34 = vsel %vm809_vm2, 65535, %v3264_v3  ;;  %vm915_vm7 = vcmask 228352  }
  0x17   :  { %433 = vmatpush1.bf16.msra.mxu0 %v3017_v11  ;;  %v3094_v0 = vld [vmem:[%s4090_s1 + $0x1c8] ss:$16 sps:$4 sm:$0xff]   ;;  %v3095_v1 = vld [vmem:[%s4090_s1 + $0x1ec] ss:$16 sps:$4 sm:$0xff]  }
  0x18   :  { %434 = vmatprep.subr.bf16.mxu0 %v3018_v12  ;;  %v3097_v2 = vld [vmem:[%s4090_s1 + $0x1e8] ss:$16 sps:$4 sm:$0xff]   ;;  %522 = vperm.xlu0 %2998, %v514_v5   ;;  %v3103_v21 = vld [vmem:[%s4094_s4 + $0x14] ss:$8 sps:$4 sm:$0xff]   ;;  %v3106_v25 = vld [vmem:[%s4094_s4 + $0x4] ss:$8 sps:$4 sm:$0xff]  }
  0x19   :  { %474 = vmatpush1.bf16.msra.mxu1 %v3067_v36  ;;  %v3099_v14 = vld [vmem:[%s4092_s2 + $0x8] sm:$0xff]   ;;  %v3112_v29 = vld [vmem:[%s4094_s4 + $0x34] ss:$8 sps:$4 sm:$0xff]   ;;  %v3110_v30 = vld [vmem:[%s4094_s4 + $0x30] ss:$8 sps:$4 sm:$0xff]  }
  0x1a   :  { %475 = vmatprep.subr.bf16.mxu1 %v3068_v38  ;;  %v3104_v26 = vld [vmem:[%s4094_s4] ss:$8 sps:$4 sm:$0xff]  }
  0x1b   :  { %435 = vmatpush1.bf16.msra.mxu0 %v3020_v13  ;;  %v3098_v13 = vld [vmem:[%s4092_s2] sm:$0xff]   ;;  %v519_v38 = vld [vmem:[%s4093_s3 + $0x28] sm:$0xff] }
  0x1c   :  { %436 = vmatprep.subr.bf16.mxu0 %v3021_v19 }
  0x1d   :  { %476 = vmatpush1.bf16.msra.mxu1 %v3070_v40 }
  0x1e   :  { %477 = vmatprep.subr.bf16.mxu1 %v3071_v42 }
  0x1f   :  { %437 = vmatpush1.bf16.msra.mxu0 %v3023_v20 }
  0x20   :  { %438 = vmatprep.subr.bf16.mxu0 %v3024_v23 }
  0x21   :  { %478 = vmatpush1.bf16.msra.mxu1 %v3073_v44 }
  0x22   :  { %479 = vmatprep.subr.bf16.mxu1 %v3074_v46 }
  0x23   :  { %439 = vmatpush1.bf16.msra.mxu0 %v3026_v24  ;;  %v3101_v24 = vld [vmem:[%s4094_s4 + $0x10] ss:$8 sps:$4 sm:$0xff]  }
  0x24   :  { %440 = vmatprep.subr.bf16.mxu0 %v3027_v27  ;;  %v3109_v27 = vld [vmem:[%s4094_s4 + $0x24] ss:$8 sps:$4 sm:$0xff]  }
  0x25   :  { %480 = vmatpush1.bf16.msra.mxu1 %v3076_v48 }
  0x26   :  { %481 = vmatprep.subr.bf16.mxu1 %v3077_v50 }
  0x27   :  { %441 = vmatpush1.bf16.msra.mxu0 %v3029_v28  ;;  %v3107_v28 = vld [vmem:[%s4094_s4 + $0x20] ss:$8 sps:$4 sm:$0xff]  }
  0x28   :  { %442 = vmatprep.subr.bf16.mxu0 %v3030_v31  ;;  %v769_v31 = vld [vmem:[%s4094_s4 + $0x40] sm:$0x11] }
  0x29   :  { %482 = vmatpush1.bf16.msra.mxu1 %v3079_v52  ;;  %v2639_v33 = vcombine.low %v769_v31, %v769_v31 }
  0x2a   :  { %483 = vmatprep.subr.bf16.mxu1 %v3080_v54 }
  0x2b   :  { %443 = vmatpush1.bf16.msra.mxu0 %v3032_v32  ;;  %v2640_v32 = vcombine.high %v769_v31, %v769_v31  ;;  %v813_v36 = vand.u32 %v2639_v33, %v811_v34  ;;  %v3141_v31 = vld [vmem:[%s4096_s6 + $0x28] sm:$0xff]   ;;  %v3145_v33 = vld [vmem:[%s4096_s6 + $0x30] sm:$0xff]  }
  0x2c   :  { %444 = vmatprep.subr.bf16.mxu0 %v3033_v35 }
  0x2d   :  { %484 = vmatpush1.bf16.msra.mxu1 %v3082_v56  ;;  %v816_v35 = vand.u32 %v2640_v32, %v811_v34  ;;  %v3144_v32 = vld [vmem:[%s4096_s6 + $0x70] sm:$0xff]  }
  0x2e   :  { %485 = vmatprep.subr.bf16.mxu1 %v3083_v57 }
  0x2f   :  { %445 = vmatpush1.bf16.msra.mxu0 %v3035_v37  ;;  %v518_v37 = vld [vmem:[%s4093_s3 + $0x20] sm:$0xff] }
  0x30   :  { %446 = vmatprep.subr.bf16.mxu0 %v3036_v39  ;;  %540 = vperm.xlu1 %2999, %v518_v37  }
  0x31   :  { %486 = vmatpush1.bf16.msra.mxu1 %v3085_v58 }
  0x32   :  { %487 = vmatprep.subr.bf16.mxu1 %v3086_v59 }
  0x33   :  { %447 = vmatpush1.bf16.msra.mxu0 %v3038_v41 }
  0x34   :  { %448 = vmatprep.subr.bf16.mxu0 %v3039_v43  ;;  %545 = vperm.xlu1 %2999, %v519_v38  }
  0x35   :  { %488 = vmatpush1.bf16.msra.mxu1 %v3088_v60 }
  0x36   :  { %489 = vmatprep.subr.bf16.mxu1 %v3089_v61 }
  0x37   :  { %449 = vmatpush1.bf16.msra.mxu0 %v3041_v45 }
  0x38   :  { %450 = vmatprep.subr.bf16.mxu0 %v3042_v47 }
  0x39   :  { %490 = vmatpush1.bf16.msra.mxu1 %v3091_v62 }
  0x3a   :  { %491 = vmatprep.subr.bf16.mxu1 %v3092_v63 }
  0x3b   :  { %451 = vmatpush1.bf16.msra.mxu0 %v3044_v49 }
  0x3c   :  { %452 = vmatprep.subr.bf16.mxu0 %v3045_v51 }
  0x3d   :  { %492 = vmatpush1.bf16.msra.mxu1 %v3094_v0 }
  0x3e   :  { %493 = vmatprep.subr.bf16.mxu1 %v3095_v1 }
  0x3f   :  { %453 = vmatpush1.bf16.msra.mxu0 %v3047_v53 }
  0x41   :  { %494 = vmatpush1.bf16.msra.mxu1 %v3097_v2 }
  0x42   :  { %455 = vmatmul.mubr.bf16.vlgmr.msra.gmra.mrb[0].mxu0 %v2553_v55 }
  0x43   :  { %618 = vmatprep.mubr.bf16.mxu0 %v3264_v3 }
  0x44   :  { %496 = vmatmul.mubr.bf16.vlgmr.msra.gmra.mrb[0].mxu1 %v2553_v55 }
  0x45   :  { %677 = vmatprep.mubr.bf16.mxu1 %v3264_v3 }
  0x93   :  { %v532_v39 = vpop.permute.xlu0 %531 }
  0x97   :  { %v523_v40 = vpop.permute.xlu0 %522 }
  0xaf   :  { %v541_v4 = vpop.permute.xlu1 %540 }
 0x115   :  { %v456_v6 = vpop.f32.mrb[0].mxu0 }
 0x116   :  { %v504_v7 = vpack.c.bf16 %v456_v6, %v456_v6  ;;  %v458_v8 = vpop.f32.mrb[1].mxu0 }
 0x117   :  { %v505_v9 = vpack.c.bf16 %v458_v8, %v458_v8  ;;  %v460_v10 = vpop.f32.mrb[2].mxu0  ;;  %v497_v16 = vpop.f32.mrb[0].mxu1 }
 0x118   :  { %v575_v11 = vsel %vm573_vm0, %v504_v7, 0  ;;  %v461_v12 = vpop.f32.mrb[3].mxu0  ;;  %v506_v17 = vpack.c.bf16 %v497_v16, %v497_v16  ;;  %v499_v18 = vpop.f32.mrb[1].mxu1 }
 0x119   :  { %2622 = vmatprep.subr.msk.bf16.mxu0 %vm573_vm0, %v505_v9  ;;  %v507_v19 = vpack.c.bf16 %v499_v18, %v499_v18  ;;  %v501_v20 = vpop.f32.mrb[2].mxu1  ;;  %v546_v9 = vpop.permute.xlu1 %545 }
 0x11a   :  { %587 = vmatpush1.bf16.msra.mxu0 %v575_v11  ;;  %v581_v22 = vsel %vm573_vm0, %v506_v17, 0  ;;  %v502_v23 = vpop.f32.mrb[3].mxu1  ;;  %v3120_v20 = vld [vmem:[%s4096_s6 + $0x40] sm:$0xff]  }
 0x11b   :  { %2626 = vmatprep.subr.msk.bf16.mxu0 %vm573_vm0, %v507_v19  ;;  %2995 = vmatprep.subr.msk.bf16.mxu1 %vm573_vm0, %v507_v19  ;;  %v3125_v23 = vld [vmem:[%s4096_s6 + $0x8] sm:$0xff]  }
 0x11c   :  { %2996 = vmatpush1.bf16.msra.mxu1 %v581_v22 }
 0x11d   :  { %2623 = vmatmul.mubr.msk.bf16.vlgmr.msra.gmra.mrb[4].mxu0 %vm563_vm1, %v3098_v13  ;;  %818 = vmatprep.subr.bf16.mxu1 %v3103_v21  ;;  %v3121_v21 = vld [vmem:[%s4096_s6] sm:$0xff]  }
 0x11e   :  { %625 = vmatprep.mubr.bf16.mxu0 %v3264_v3  ;;  %640 = vmatpush1.bf16.msra.mxu0 %v581_v22  ;;  %v3124_v22 = vld [vmem:[%s4096_s6 + $0x48] sm:$0xff]  }
 0x11f   :  { %2628 = vmatmul.mubr.msk.bf16.vlgmr.msra.gmra.mrb[4].mxu1 %vm563_vm1, %v3099_v14  ;;  %720 = vmatprep.subr.bf16.mxu0 %v3106_v25  ;;  %v3129_v25 = vld [vmem:[%s4096_s6 + $0x10] sm:$0xff]  }
 0x120   :  { %819 = vmatpush1.bf16.msra.mxu1 %v3101_v24  ;;  %683 = vmatprep.mubr.bf16.mxu1 %v3264_v3  ;;  %v3128_v24 = vld [vmem:[%s4096_s6 + $0x50] sm:$0xff]  }
 0x121   :  { %820 = vmatprep.subr.bf16.mxu1 %v3109_v27  ;;  %v3133_v27 = vld [vmem:[%s4096_s6 + $0x18] sm:$0xff]  }
 0x124   :  { %821 = vmatpush1.bf16.msra.mxu1 %v3107_v28  ;;  %v3136_v28 = vld [vmem:[%s4096_s6 + $0x60] sm:$0xff]  }
 0x125   :  { %2624 = vmatmul.mubr.msk.bf16.gmra.mrb[8].mxu0 %vm563_vm1, %v3099_v14  ;;  %822 = vmatprep.subr.bf16.mxu1 %v3112_v29  ;;  %v3137_v29 = vld [vmem:[%s4096_s6 + $0x20] sm:$0xff]  }
 0x126   :  { %632 = vmatprep.mubr.bf16.mxu0 %v3264_v3 }
 0x127   :  { %2629 = vmatmul.mubr.msk.bf16.gmra.mrb[8].mxu1 %vm563_vm1, %v3100_v15 }
 0x128   :  { %850 = vmatprep.mubr.bf16.mxu1 %v3264_v3  ;;  %823 = vmatpush1.bf16.msra.mxu1 %v3110_v30  ;;  %v3140_v30 = vld [vmem:[%s4096_s6 + $0x68] sm:$0xff]  }
 0x129   :  { %824 = vmatprep.subr.bf16.mxu1 %v816_v35 }
 0x12c   :  { %825 = vmatpush1.bf16.msra.mxu1 %v813_v36 }
 0x12d   :  { %2625 = vmatmul.mubr.msk.bf16.gmra.mrb[12].mxu0 %vm563_vm1, %v3100_v15  ;;  %2797 = vmatprep.subr.bf16.mxu1 %v3120_v20  ;;  %v3153_v20 = vld [vmem:[%s4096_s6 + $0x100] sm:$0xff]  }
 0x12e   :  { %671 = vmatprep.mubr.bf16.mxu0 %v3264_v3 }
 0x135   :  { %2627 = vmatmul.mubr.msk.bf16.vlgmr.msra.gmra.mrb[16].mxu0 %vm563_vm1, %v3098_v13 }
 0x136   :  { %752 = vmatprep.mubr.bf16.mxu0 %v3264_v3  ;;  %721 = vmatpush1.bf16.msra.mxu0 %v3104_v26  ;;  %v3132_v26 = vld [vmem:[%s4096_s6 + $0x58] sm:$0xff]  }
 0x1f0   :  { %v620_v41 = vpop.f32.mrb[4].mxu0 }
 0x1f1   :  { %v621_v42 = vadd.f32 %v620_v41, %v523_v40  ;;  %v622_v43 = vpop.f32.mrb[5].mxu0 }
 0x1f2   :  { %v623_v44 = vpop.f32.mrb[6].mxu0  ;;  %v679_v59 = vpop.f32.mrb[4].mxu1 }
 0x1f3   :  { %v694_v45 = vmax.f32 %v621_v42, 0.0  ;;  %v624_v46 = vpop.f32.mrb[7].mxu0  ;;  %v680_v60 = vpop.f32.mrb[5].mxu1  ;;  %v3127_v59 = vld [vmem:[%s4096_s6 + $0x88] sm:$0xff]  }
 0x1f4   :  { %v681_v62 = vpop.f32.mrb[6].mxu1  ;;  %v3130_v60 = vld [vmem:[%s4096_s6 + $0xd0] sm:$0xff]  }
 0x1f5   :  { %v700_v47 = vpack.c.bf16 %v694_v45, %v694_v45  ;;  %v682_v0 = vpop.f32.mrb[7].mxu1  ;;  %v3131_v62 = vld [vmem:[%s4096_s6 + $0x90] sm:$0xff]  }
 0x1f6   :  { %v3135_v0 = vld [vmem:[%s4096_s6 + $0x98] sm:$0xff]  }
 0x1f7   :  { %2632 = vmatmul.mubr.msk.bf16.vlgmr.msra.gmra.mrb[20].mxu0 %vm716_vm3, %v700_v47 }
 0x1f8   :  { %v627_v48 = vpop.f32.mrb[8].mxu0  ;;  %967 = vmatprep.mubr.bf16.mxu0 %v3264_v3 }
 0x1f9   :  { %v628_v49 = vpop.f32.mrb[9].mxu0 }
 0x1fa   :  { %v629_v50 = vadd.f32 %v628_v49, %v532_v39  ;;  %v630_v51 = vpop.f32.mrb[10].mxu0  ;;  %v685_v5 = vpop.f32.mrb[8].mxu1 }
 0x1fb   :  { %v631_v52 = vpop.f32.mrb[11].mxu0  ;;  %v687_v6 = vpop.f32.mrb[9].mxu1  ;;  %v686_v8 = vadd.f32 %v685_v5, %v541_v4  ;;  %v3142_v5 = vld [vmem:[%s4096_s6 + $0xe8] sm:$0xff]  }
 0x1fc   :  { %v695_v53 = vmax.f32 %v629_v50, 0.0  ;;  %v689_v7 = vpop.f32.mrb[10].mxu1  ;;  %v688_v11 = vadd.f32 %v687_v6, %v541_v4  ;;  %v3139_v4 = vld [vmem:[%s4096_s6 + $0xa0] sm:$0xff]   ;;  %v3143_v6 = vld [vmem:[%s4096_s6 + $0xa8] sm:$0xff]  }
 0x1fd   :  { %v691_v10 = vpop.f32.mrb[11].mxu1  ;;  %v690_v12 = vadd.f32 %v689_v7, %v546_v9  ;;  %v696_v14 = vmax.f32 %v686_v8, 0.0  ;;  %v3146_v7 = vld [vmem:[%s4096_s6 + $0xf0] sm:$0xff]   ;;  %v3118_v8 = vld [vmem:[%s4095_s5 + $0x18] sm:$0xff]  }
 0x1fe   :  { %v701_v54 = vpack.c.bf16 %v695_v53, %v695_v53  ;;  %v692_v13 = vadd.f32 %v691_v10, %v546_v9  ;;  %v697_v15 = vmax.f32 %v688_v11, 0.0  ;;  %v3147_v9 = vld [vmem:[%s4096_s6 + $0xb0] sm:$0xff]   ;;  %v3119_v10 = vld [vmem:[%s4095_s5 + $0x20] ss:$0 sps:$4 sm:$0xff]   ;;  %v3148_v11 = vld [vmem:[%s4096_s6 + $0x78] sm:$0xff]  }
 0x1ff   :  { %v698_v16 = vmax.f32 %v690_v12, 0.0  ;;  %v3149_v12 = vld [vmem:[%s4096_s6 + $0x38] sm:$0xff]  }
 0x200   :  { %2641 = vmatmul.mubr.msk.bf16.vlgmr.msra.gmra.mrb[12].mxu1 %vm805_vm4, %v701_v54  ;;  %v634_v55 = vpop.f32.mrb[12].mxu0  ;;  %v699_v17 = vmax.f32 %v692_v13, 0.0  ;;  %v3151_v13 = vld [vmem:[%s4096_s6 + $0xb8] sm:$0xff]  }
 0x201   :  { %v635_v56 = vpop.f32.mrb[13].mxu0  ;;  %v702_v18 = vpack.c.bf16 %v698_v16, %v696_v14  ;;  %2798 = vmatpush3.bf16.msra.mxu1 %v3121_v21  ;;  %v3122_v55 = vld [vmem:[%s4096_s6 + $0xc0] sm:$0xff]  }
 0x202   :  { %v636_v57 = vpop.f32.mrb[14].mxu0  ;;  %v703_v19 = vpack.c.bf16 %v699_v17, %v697_v15  ;;  %2799 = vmatprep.subr.bf16.mxu1 %v3124_v22  ;;  %v3115_v56 = vld [vmem:[%s4095_s5] sm:$0xff]  }
 0x203   :  { %v637_v58 = vpop.f32.mrb[15].mxu0  ;;  %v867_v38 = vrot.slane %v702_v18, 2  ;;  %v3123_v57 = vld [vmem:[%s4096_s6 + $0x80] sm:$0xff]  }
 0x204   :  { %v868_v39 = vrot.slane %v703_v19, 2  ;;  %v3126_v58 = vld [vmem:[%s4096_s6 + $0xc8] sm:$0xff]   ;;  %v3152_v14 = vld [vmem:[%s4096_s6 + $0x140] sm:$0xff]  }
 0x205   :  { %2800 = vmatpush3.bf16.msra.mxu1 %v3125_v23  ;;  %v931_v50 = vsel %vm876_vm5, %v867_v38, 0  ;;  %v3154_v15 = vld [vmem:[%s4096_s6 + $0x1c0] sm:$0xff]   ;;  %v3156_v23 = vld [vmem:[%s4096_s6 + $0x148] sm:$0xff]  }
 0x206   :  { %2801 = vmatprep.subr.bf16.mxu1 %v3128_v24 }
 0x208   :  { %v673_v61 = vpop.f32.mrb[16].mxu0 }
 0x209   :  { %v674_v63 = vpop.f32.mrb[17].mxu0  ;;  %2802 = vmatpush3.bf16.msra.mxu1 %v3129_v25  ;;  %v3116_v61 = vld [vmem:[%s4095_s5 + $0x8] sm:$0xff]   ;;  %v3155_v25 = vld [vmem:[%s4096_s6 + $0x180] sm:$0xff]  }
 0x20a   :  { %v675_v1 = vpop.f32.mrb[18].mxu0  ;;  %2803 = vmatprep.subr.bf16.mxu1 %v3132_v26  ;;  %v3134_v63 = vld [vmem:[%s4096_s6 + $0xd8] sm:$0xff]  }
 0x20b   :  { %v676_v2 = vpop.f32.mrb[19].mxu0  ;;  %v3138_v1 = vld [vmem:[%s4096_s6 + $0xe0] sm:$0xff]  }
 0x20c   :  { %v3117_v2 = vld [vmem:[%s4095_s5 + $0x10] sm:$0xff]  }
 0x20d   :  { %2804 = vmatpush3.bf16.msra.mxu1 %v3133_v27  ;;  %v3158_v27 = vld [vmem:[%s4096_s6 + $0x1c8] sm:$0xff]  }
 0x20e   :  { %2805 = vmatprep.subr.bf16.mxu1 %v3136_v28  ;;  %v3157_v28 = vld [vmem:[%s4096_s6 + $0x108] sm:$0xff]  }
 0x211   :  { %2806 = vmatpush3.bf16.msra.mxu1 %v3137_v29  ;;  %v3160_v29 = vld [vmem:[%s4096_s6 + $0x150] sm:$0xff]  }
 0x212   :  { %2807 = vmatprep.subr.bf16.mxu1 %v3140_v30  ;;  %v3159_v30 = vld [vmem:[%s4096_s6 + $0x188] sm:$0xff]  }
 0x215   :  { %2808 = vmatpush3.bf16.msra.mxu1 %v3141_v31 }
 0x216   :  { %2809 = vmatprep.subr.bf16.mxu1 %v3144_v32  ;;  %v3162_v32 = vld [vmem:[%s4096_s6 + $0x1d0] sm:$0xff]  }
 0x219   :  { %2810 = vmatpush3.bf16.msra.mxu1 %v3145_v33 }
 0x21a   :  { %2811 = vmatprep.subr.bf16.mxu1 %v3148_v11 }
 0x21d   :  { %2812 = vmatpush3.bf16.msra.mxu1 %v3149_v12 }
 0x21e   :  { %2841 = vmatprep.subr.bf16.mxu1 %v3152_v14  ;;  %v3187_v14 = vld [vmem:[%s4096_s6 + $0x280] sm:$0xff]  }
 0x2ca   :  { %v754_v34 = vpop.f32.mrb[20].mxu0 }
 0x2cb   :  { %v756_v35 = vpop.f32.mrb[21].mxu0  ;;  %v761_v45 = vpack.c.bf16 %v754_v34, %v754_v34  ;;  %v3161_v34 = vld [vmem:[%s4096_s6 + $0x110] sm:$0xff]  }
 0x2cc   :  { %v758_v36 = vpop.f32.mrb[22].mxu0  ;;  %v762_v48 = vpack.c.bf16 %v756_v35, %v756_v35 }
 0x2cd   :  { %v759_v37 = vpop.f32.mrb[23].mxu0 }
 0x2ce   :  { %v3164_v37 = vld [vmem:[%s4096_s6 + $0x158] sm:$0xff]  }
 0x2d3   :  { %v852_v40 = vpop.f32.mrb[12].mxu1 }
 0x2d4   :  { %v859_v41 = vpack.c.bf16 %v852_v40, %v852_v40  ;;  %v854_v42 = vpop.f32.mrb[13].mxu1 }
 0x2d5   :  { %v860_v43 = vpack.c.bf16 %v854_v42, %v854_v42  ;;  %v856_v44 = vpop.f32.mrb[14].mxu1  ;;  %v3165_v42 = vld [vmem:[%s4096_s6 + $0x118] sm:$0xff]  }
 0x2d6   :  { %v863_v46 = vrot.slane %v859_v41, 6  ;;  %v857_v47 = vpop.f32.mrb[15].mxu1  ;;  %v3166_v41 = vld [vmem:[%s4096_s6 + $0x1d8] sm:$0xff]  }
 0x2d7   :  { %v864_v49 = vrot.slane %v860_v43, 6  ;;  %v3168_v43 = vld [vmem:[%s4096_s6 + $0x160] sm:$0xff]   ;;  %v3167_v44 = vld [vmem:[%s4096_s6 + $0x198] sm:$0xff]  }
 0x2d8   :  { %v872_v51 = vsel %vm869_vm6, %v761_v45, %v863_v46  ;;  %v3170_v46 = vld [vmem:[%s4096_s6 + $0x1e0] sm:$0xff]  }
 0x2d9   :  { %v875_v52 = vsel %vm869_vm6, %v762_v48, %v864_v49  ;;  %v878_v53 = vsel %vm876_vm5, %v872_v51, %v867_v38  ;;  %v3169_v48 = vld [vmem:[%s4096_s6 + $0x120] sm:$0xff]  }
 0x2da   :  { %v881_v54 = vsel %vm876_vm5, %v875_v52, %v868_v39  ;;  %v3171_v52 = vld [vmem:[%s4096_s6 + $0x1a0] sm:$0xff]  }
 0x2db   :  { %935 = vmatprep.subr.bf16.mxu0 %v881_v54  ;;  %v3173_v54 = vld [vmem:[%s4096_s6 + $0x128] sm:$0xff]  }
 0x2dc   :  { %936 = vmatpush1.bf16.msra.mxu0 %v878_v53  ;;  %v3174_v53 = vld [vmem:[%s4096_s6 + $0x1e8] sm:$0xff]  }
 0x2dd   :  { %2647 = vmatprep.subr.msk.bf16.mxu0 %vm876_vm5, %v868_v39  ;;  %v3163_v39 = vld [vmem:[%s4096_s6 + $0x190] sm:$0xff]  }
 0x2e0   :  { %938 = vmatpush1.bf16.msra.mxu0 %v931_v50  ;;  %v3172_v50 = vld [vmem:[%s4096_s6 + $0x168] sm:$0xff]  }
 0x2e1   :  { %2819 = vmatprep.subr.bf16.mxu0 %v3122_v55  ;;  %v3176_v55 = vld [vmem:[%s4096_s6 + $0x170] sm:$0xff]  }
 0x2e3   :  { %2648 = vmatmul.mubr.msk.bf16.vlgmr.msra.gmra.mrb[24].mxu0 %vm915_vm7, %v3115_v56  ;;  %v3175_v56 = vld [vmem:[%s4096_s6 + $0x1a8] sm:$0xff]  }
 0x2e4   :  { %977 = vmatprep.mubr.bf16.mxu0 %v3264_v3  ;;  %2820 = vmatpush3.bf16.msra.mxu0 %v3123_v57 }
 0x2e5   :  { %2821 = vmatprep.subr.bf16.mxu0 %v3126_v58  ;;  %v3178_v58 = vld [vmem:[%s4096_s6 + $0x1f0] sm:$0xff]  }
 0x2e8   :  { %2822 = vmatpush3.bf16.msra.mxu0 %v3127_v59 }
 0x2e9   :  { %2823 = vmatprep.subr.bf16.mxu0 %v3130_v60  ;;  %v3177_v60 = vld [vmem:[%s4096_s6 + $0x130] sm:$0xff]  }
 0x2eb   :  { %2649 = vmatmul.mubr.msk.bf16.gmra.mrb[28].mxu0 %vm915_vm7, %v3116_v61 }
 0x2ec   :  { %987 = vmatprep.mubr.bf16.mxu0 %v3264_v3  ;;  %2824 = vmatpush3.bf16.msra.mxu0 %v3131_v62  ;;  %v3180_v62 = vld [vmem:[%s4096_s6 + $0x178] sm:$0xff]  }
 0x2ed   :  { %2825 = vmatprep.subr.bf16.mxu0 %v3134_v63 }
 0x2f0   :  { %2826 = vmatpush3.bf16.msra.mxu0 %v3135_v0  ;;  %v3179_v0 = vld [vmem:[%s4096_s6 + $0x1b0] sm:$0xff]  }
 0x2f1   :  { %2827 = vmatprep.subr.bf16.mxu0 %v3138_v1  ;;  %v3182_v1 = vld [vmem:[%s4096_s6 + $0x1f8] sm:$0xff]  }
 0x2f3   :  { %2650 = vmatmul.mubr.msk.bf16.gmra.mrb[32].mxu0 %vm915_vm7, %v3117_v2  ;;  %v3181_v2 = vld [vmem:[%s4096_s6 + $0x138] sm:$0xff]  }
 0x2f4   :  { %997 = vmatprep.mubr.bf16.mxu0 %v3264_v3  ;;  %2828 = vmatpush3.bf16.msra.mxu0 %v3139_v4  ;;  %v3184_v4 = vld [vmem:[%s4096_s6 + $0x240] sm:$0xff]  }
 0x2f5   :  { %2829 = vmatprep.subr.bf16.mxu0 %v3142_v5  ;;  %v3183_v5 = vld [vmem:[%s4096_s6 + $0x1b8] sm:$0xff]  }
 0x2f8   :  { %2830 = vmatpush3.bf16.msra.mxu0 %v3143_v6 }
 0x2f9   :  { %2831 = vmatprep.subr.bf16.mxu0 %v3146_v7 }
 0x2fb   :  { %2651 = vmatmul.mubr.msk.bf16.gmra.mrb[36].mxu0 %vm915_vm7, %v3118_v8  ;;  %v3186_v8 = vld [vmem:[%s4096_s6 + $0x2c0] sm:$0xff]  }
 0x2fc   :  { %1007 = vmatprep.mubr.bf16.mxu0 %v3264_v3  ;;  %2832 = vmatpush3.bf16.msra.mxu0 %v3147_v9  ;;  %v3150_v3 = vld [vmem:[%s4096_s6 + $0xf8] sm:$0xff]  }
 0x2fd   :  { %2833 = vmatprep.subr.bf16.mxu0 %v3150_v3  ;;  %v3188_v3 = vld [vmem:[%s4096_s6 + $0x248] sm:$0xff]  }
 0x300   :  { %2834 = vmatpush3.bf16.msra.mxu0 %v3151_v13 }
 0x301   :  { %2863 = vmatprep.subr.bf16.mxu0 %v3154_v15 }
 0x303   :  { %2652 = vmatmul.mubr.msk.bf16.gmra.mrb[40].mxu0 %vm915_vm7, %v3119_v10  ;;  %v3185_v10 = vld [vmem:[%s4096_s6 + $0x200] sm:$0xff]  }
 0x3b6   :  { %v969_v16 = vpop.f32.mrb[24].mxu0 }
 0x3b7   :  { %v971_v17 = vpop.f32.mrb[25].mxu0  ;;  %v1016_v21 = vpack.c.bf16 %v969_v16, %v969_v16 }
 0x3b8   :  { %v1017_v18 = vpack.c.bf16 %v971_v17, %v971_v17  ;;  %v973_v19 = vpop.f32.mrb[26].mxu0  ;;  %v3190_v17 = vld [vmem:[%s4096_s6 + $0x2c8] sm:$0xff]  }
 0x3b9   :  { %v975_v22 = vpop.f32.mrb[27].mxu0  ;;  %v1018_v26 = vpack.c.bf16 %v973_v19, %v973_v19  ;;  %v3192_v19 = vld [vmem:[%s4096_s6 + $0x250] sm:$0xff]  }
 0x3ba   :  { %v1019_v24 = vpack.c.bf16 %v975_v22, %v975_v22  ;;  %2219 = vmatprep.mubr.bf16.mxu1 %v1017_v18  ;;  %v3189_v18 = vld [vmem:[%s4096_s6 + $0x208] sm:$0xff]   ;;  %v3193_v22 = vld [vmem:[%s4096_s6 + $0x210] sm:$0xff]  }
 0x3bb   :  { %2220 = vmatmul.mubr.bf16.vlgmr.msra.gmra.mrb[16].mxu1 %v1016_v21  ;;  %v3194_v21 = vld [vmem:[%s4096_s6 + $0x2d0] sm:$0xff]  }
 0x3bc   :  { %2842 = vmatpush3.bf16.msra.mxu1 %v3153_v20  ;;  %2259 = vmatprep.mubr.bf16.mxu0 %v1019_v24  ;;  %v3191_v20 = vld [vmem:[%s4096_s6 + $0x288] sm:$0xff]   ;;  %v3195_v24 = vld [vmem:[%s4096_s6 + $0x290] sm:$0xff]  }
 0x3bd   :  { %2260 = vmatmul.mubr.bf16.vlgmr.msra.gmra.mrb[44].mxu0 %v1018_v26  ;;  %2843 = vmatprep.subr.bf16.mxu1 %v3156_v23  ;;  %v3196_v23 = vld [vmem:[%s4096_s6 + $0x258] sm:$0xff]  }
 0x3be   :  { %2864 = vmatpush3.bf16.msra.mxu0 %v3155_v25  ;;  %v3734_v31 = vpop.f32.mrb[28].mxu0  ;;  %v3198_v25 = vld [vmem:[%s4096_s6 + $0x2d8] sm:$0xff]  }
 0x3bf   :  { %2865 = vmatprep.subr.bf16.mxu0 %v3158_v27  ;;  %v981_v33 = vpop.f32.mrb[29].mxu0  ;;  %v1020_v7 = vpack.c.bf16 %v3734_v31, %v3734_v31  ;;  %v3197_v26 = vld [vmem:[%s4096_s6 + $0x218] sm:$0xff]   ;;  %v3200_v27 = vld [vmem:[%s4096_s6 + $0x260] sm:$0xff]   ;;  %v3204_v31 = vld [vmem:[%s4096_s6 + $0x268] sm:$0xff]  }
 0x3c0   :  { %2844 = vmatpush3.bf16.msra.mxu1 %v3157_v28  ;;  %v1021_v35 = vpack.c.bf16 %v981_v33, %v981_v33  ;;  %v3742_v36 = vpop.f32.mrb[30].mxu0  ;;  %v3199_v28 = vld [vmem:[%s4096_s6 + $0x298] sm:$0xff]   ;;  %v3206_v33 = vld [vmem:[%s4096_s6 + $0x2e8] sm:$0xff]  }
 0x3c1   :  { %2845 = vmatprep.subr.bf16.mxu1 %v3160_v29  ;;  %v985_v38 = vpop.f32.mrb[31].mxu0  ;;  %v1022_v16 = vpack.c.bf16 %v3742_v36, %v3742_v36  ;;  %v3202_v29 = vld [vmem:[%s4096_s6 + $0x2e0] sm:$0xff]   ;;  %v3207_v36 = vld [vmem:[%s4096_s6 + $0x2a8] sm:$0xff]  }
 0x3c2   :  { %2866 = vmatpush3.bf16.msra.mxu0 %v3159_v30  ;;  %v1023_v40 = vpack.c.bf16 %v985_v38, %v985_v38  ;;  %2299 = vmatprep.mubr.bf16.mxu1 %v1021_v35  ;;  %v3201_v30 = vld [vmem:[%s4096_s6 + $0x220] sm:$0xff]   ;;  %v3208_v35 = vld [vmem:[%s4096_s6 + $0x270] sm:$0xff]  }
 0x3c3   :  { %2867 = vmatprep.subr.bf16.mxu0 %v3162_v32  ;;  %v3203_v32 = vld [vmem:[%s4096_s6 + $0x2a0] sm:$0xff]   ;;  %v3209_v38 = vld [vmem:[%s4096_s6 + $0x230] sm:$0xff]  }
 0x3c4   :  { %2846 = vmatpush3.bf16.msra.mxu1 %v3161_v34  ;;  %2339 = vmatprep.mubr.bf16.mxu0 %v1023_v40  ;;  %v3205_v34 = vld [vmem:[%s4096_s6 + $0x228] sm:$0xff]   ;;  %v3211_v40 = vld [vmem:[%s4096_s6 + $0x2b0] sm:$0xff]  }
 0x3c5   :  { %2847 = vmatprep.subr.bf16.mxu1 %v3164_v37  ;;  %v3210_v37 = vld [vmem:[%s4096_s6 + $0x2f0] sm:$0xff]  }
 0x3c6   :  { %2868 = vmatpush3.bf16.msra.mxu0 %v3163_v39  ;;  %v3762_v45 = vpop.f32.mrb[32].mxu0  ;;  %v3212_v39 = vld [vmem:[%s4096_s6 + $0x278] sm:$0xff]  }
 0x3c7   :  { %2869 = vmatprep.subr.bf16.mxu0 %v3166_v41  ;;  %v991_v47 = vpop.f32.mrb[33].mxu0  ;;  %v3214_v41 = vld [vmem:[%s4096_s6 + $0x2f8] sm:$0xff]  }
 0x3c8   :  { %2848 = vmatpush3.bf16.msra.mxu1 %v3165_v42  ;;  %v3770_v49 = vpop.f32.mrb[34].mxu0  ;;  %v1025_v11 = vpack.c.bf16 %v991_v47, %v991_v47  ;;  %v3213_v42 = vld [vmem:[%s4096_s6 + $0x238] sm:$0xff]   ;;  %v3218_v47 = vld [vmem:[%s4096_s6 + $0x3c0] sm:$0xff]  }
 0x3c9   :  { %2849 = vmatprep.subr.bf16.mxu1 %v3168_v43  ;;  %v995_v51 = vpop.f32.mrb[35].mxu0  ;;  %v3216_v43 = vld [vmem:[%s4096_s6 + $0x340] sm:$0xff]  }
 0x3ca   :  { %2870 = vmatpush3.bf16.msra.mxu0 %v3167_v44  ;;  %v1027_v15 = vpack.c.bf16 %v995_v51, %v995_v51  ;;  %v3215_v44 = vld [vmem:[%s4096_s6 + $0x2b8] sm:$0xff]   ;;  %v3220_v51 = vld [vmem:[%s4096_s6 + $0x348] sm:$0xff]  }
 0x3cb   :  { %2871 = vmatprep.subr.bf16.mxu0 %v3170_v46  ;;  %v1024_v46 = vpack.c.bf16 %v3762_v45, %v3762_v45  ;;  %v3219_v45 = vld [vmem:[%s4096_s6 + $0x380] sm:$0xff]  }
 0x3cc   :  { %2850 = vmatpush3.bf16.msra.mxu1 %v3169_v48  ;;  %v3217_v48 = vld [vmem:[%s4096_s6 + $0x300] sm:$0xff]  }
 0x3cd   :  { %2851 = vmatprep.subr.bf16.mxu1 %v3172_v50 }
 0x3ce   :  { %2872 = vmatpush3.bf16.msra.mxu0 %v3171_v52  ;;  %v3790_v57 = vpop.f32.mrb[36].mxu0 }
 0x3cf   :  { %2873 = vmatprep.subr.bf16.mxu0 %v3174_v53  ;;  %v3795_v59 = vpop.f32.mrb[37].mxu0  ;;  %v1026_v53 = vpack.c.bf16 %v3770_v49, %v3770_v49  ;;  %v3223_v49 = vld [vmem:[%s4096_s6 + $0x388] sm:$0xff]  }
 0x3d0   :  { %2852 = vmatpush3.bf16.msra.mxu1 %v3173_v54  ;;  %v3800_v61 = vpop.f32.mrb[38].mxu0  ;;  %v1029_v50 = vpack.c.bf16 %v3795_v59, %v3795_v59  ;;  %v3222_v54 = vld [vmem:[%s4096_s6 + $0x3c8] sm:$0xff]   ;;  %v3225_v59 = vld [vmem:[%s4096_s6 + $0x310] sm:$0xff]  }
 0x3d1   :  { %2853 = vmatprep.subr.bf16.mxu1 %v3176_v55  ;;  %v3805_v63 = vpop.f32.mrb[39].mxu0  ;;  %v3221_v55 = vld [vmem:[%s4096_s6 + $0x308] sm:$0xff]  }
 0x3d2   :  { %2874 = vmatpush3.bf16.msra.mxu0 %v3175_v56  ;;  %v1031_v52 = vpack.c.bf16 %v3805_v63, %v3805_v63  ;;  %v3224_v56 = vld [vmem:[%s4096_s6 + $0x350] sm:$0xff]   ;;  %v3230_v63 = vld [vmem:[%s4096_s6 + $0x3d8] sm:$0xff]  }
 0x3d3   :  { %2875 = vmatprep.subr.bf16.mxu0 %v3178_v58  ;;  %v3226_v58 = vld [vmem:[%s4096_s6 + $0x3d0] sm:$0xff]  }
 0x3d4   :  { %2854 = vmatpush3.bf16.msra.mxu1 %v3177_v60  ;;  %v3228_v60 = vld [vmem:[%s4096_s6 + $0x358] sm:$0xff]  }
 0x3d5   :  { %2855 = vmatprep.subr.bf16.mxu1 %v3180_v62  ;;  %v3227_v62 = vld [vmem:[%s4096_s6 + $0x390] sm:$0xff]  }
 0x3d6   :  { %2876 = vmatpush3.bf16.msra.mxu0 %v3179_v0  ;;  %v3822_v6 = vpop.f32.mrb[40].mxu0  ;;  %v3229_v0 = vld [vmem:[%s4096_s6 + $0x318] sm:$0xff]  }
 0x3d7   :  { %2877 = vmatprep.subr.bf16.mxu0 %v3182_v1  ;;  %v3829_v9 = vpop.f32.mrb[41].mxu0  ;;  %v3232_v1 = vld [vmem:[%s4096_s6 + $0x360] sm:$0xff]  }
 0x3d8   :  { %2856 = vmatpush3.bf16.msra.mxu1 %v3181_v2  ;;  %v1013_v12 = vpop.f32.mrb[42].mxu0  ;;  %v3231_v2 = vld [vmem:[%s4096_s6 + $0x398] sm:$0xff]  }
 0x3d9   :  { %2885 = vmatprep.subr.bf16.mxu1 %v3184_v4  ;;  %v1014_v13 = vpop.f32.mrb[43].mxu0  ;;  %v3234_v4 = vld [vmem:[%s4096_s6 + $0x3e0] sm:$0xff]   ;;  %v3240_v12 = vld [vmem:[%s4096_s6 + $0x370] sm:$0xff]  }
 0x3da   :  { %2878 = vmatpush3.bf16.msra.mxu0 %v3183_v5  ;;  %v3233_v5 = vld [vmem:[%s4096_s6 + $0x320] sm:$0xff]   ;;  %v3242_v13 = vld [vmem:[%s4096_s6 + $0x3f0] sm:$0xff]  }
 0x3db   :  { %2300 = vmatmul.mubr.bf16.vlgmr.msra.gmra.mrb[20].mxu1 %v1020_v7  ;;  %2907 = vmatprep.subr.bf16.mxu0 %v3186_v8  ;;  %v3236_v7 = vld [vmem:[%s4096_s6 + $0x368] sm:$0xff]   ;;  %v3235_v8 = vld [vmem:[%s4096_s6 + $0x3a0] sm:$0xff]  }
 0x3dc   :  { %2886 = vmatpush3.bf16.msra.mxu1 %v3185_v10  ;;  %2379 = vmatprep.mubr.bf16.mxu1 %v1025_v11  ;;  %v3238_v10 = vld [vmem:[%s4096_s6 + $0x3e8] sm:$0xff]  }
 0x3dd   :  { %2340 = vmatmul.mubr.bf16.vlgmr.msra.gmra.mrb[48].mxu0 %v1022_v16  ;;  %2887 = vmatprep.subr.bf16.mxu1 %v3188_v3  ;;  %v3237_v11 = vld [vmem:[%s4096_s6 + $0x328] sm:$0xff]   ;;  %v3243_v16 = vld [vmem:[%s4096_s6 + $0x3b0] sm:$0xff]  }
 0x3de   :  { %2908 = vmatpush3.bf16.msra.mxu0 %v3187_v14  ;;  %2419 = vmatprep.mubr.bf16.mxu0 %v1027_v15  ;;  %v3239_v3 = vld [vmem:[%s4096_s6 + $0x3a8] sm:$0xff]   ;;  %v3241_v14 = vld [vmem:[%s4096_s6 + $0x330] sm:$0xff]   ;;  %v3244_v15 = vld [vmem:[%s4096_s6 + $0x378] sm:$0xff]  }
 0x3df   :  { %2909 = vmatprep.subr.bf16.mxu0 %v3190_v17  ;;  %v3246_v17 = vld [vmem:[%s4096_s6 + $0x3f8] sm:$0xff]  }
 0x3e0   :  { %2888 = vmatpush3.bf16.msra.mxu1 %v3189_v18  ;;  %v3245_v18 = vld [vmem:[%s4096_s6 + $0x338] sm:$0xff]  }
 0x3e1   :  { %2889 = vmatprep.subr.bf16.mxu1 %v3192_v19  ;;  %v3248_v19 = vld [vmem:[%s4096_s6 + $0x440] sm:$0xff]  }
 0x3e2   :  { %2910 = vmatpush3.bf16.msra.mxu0 %v3191_v20  ;;  %v3247_v20 = vld [vmem:[%s4096_s6 + $0x3b8] sm:$0xff]  }
 0x3e3   :  { %2911 = vmatprep.subr.bf16.mxu0 %v3194_v21  ;;  %v1028_v21 = vpack.c.bf16 %v3790_v57, %v3790_v57  ;;  %v3251_v57 = vld [vmem:[%s4096_s6 + $0x408] sm:$0xff]  }
 0x3e4   :  { %2890 = vmatpush3.bf16.msra.mxu1 %v3193_v22  ;;  %v3249_v22 = vld [vmem:[%s4096_s6 + $0x400] sm:$0xff]  }
 0x3e5   :  { %2891 = vmatprep.subr.bf16.mxu1 %v3196_v23  ;;  %v1033_v23 = vpack.c.bf16 %v3829_v9, %v3829_v9  ;;  %v3252_v9 = vld [vmem:[%s4096_s6 + $0x450] sm:$0xff]  }
 0x3e6   :  { %2912 = vmatpush3.bf16.msra.mxu0 %v3195_v24  ;;  %v3250_v24 = vld [vmem:[%s4096_s6 + $0x448] sm:$0xff]  }
 0x3e7   :  { %2913 = vmatprep.subr.bf16.mxu0 %v3198_v25  ;;  %v1030_v25 = vpack.c.bf16 %v3800_v61, %v3800_v61  ;;  %v3254_v61 = vld [vmem:[%s4096_s6 + $0x458] sm:$0xff]  }
 0x3e8   :  { %2892 = vmatpush3.bf16.msra.mxu1 %v3197_v26  ;;  %v3253_v26 = vld [vmem:[%s4096_s6 + $0x410] sm:$0xff]  }
 0x3e9   :  { %2893 = vmatprep.subr.bf16.mxu1 %v3200_v27  ;;  %v3255_v27 = vld [vmem:[%s4096_s6 + $0x418] sm:$0xff]  }
 0x3ea   :  { %2914 = vmatpush3.bf16.msra.mxu0 %v3199_v28  ;;  %v3256_v28 = vld [vmem:[%s4096_s6 + $0x460] sm:$0xff]  }
 0x3eb   :  { %2915 = vmatprep.subr.bf16.mxu0 %v3202_v29  ;;  %v3257_v29 = vld [vmem:[%s4096_s6 + $0x420] sm:$0xff]  }
 0x3ec   :  { %2894 = vmatpush3.bf16.msra.mxu1 %v3201_v30  ;;  %v3258_v30 = vld [vmem:[%s4096_s6 + $0x468] sm:$0xff]  }
 0x3ed   :  { %2895 = vmatprep.subr.bf16.mxu1 %v3204_v31  ;;  %v3259_v31 = vld [vmem:[%s4096_s6 + $0x428] sm:$0xff]  }
 0x3ee   :  { %2916 = vmatpush3.bf16.msra.mxu0 %v3203_v32  ;;  %v3260_v32 = vld [vmem:[%s4096_s6 + $0x470] sm:$0xff]  }
 0x3ef   :  { %2917 = vmatprep.subr.bf16.mxu0 %v3206_v33  ;;  %v3261_v33 = vld [vmem:[%s4096_s6 + $0x430] sm:$0xff]  }
 0x3f0   :  { %2896 = vmatpush3.bf16.msra.mxu1 %v3205_v34  ;;  %v3262_v34 = vld [vmem:[%s4096_s6 + $0x478] sm:$0xff]  }
 0x3f1   :  { %2897 = vmatprep.subr.bf16.mxu1 %v3208_v35  ;;  %v3263_v35 = vld [vmem:[%s4096_s6 + $0x438] sm:$0xff]  }
 0x3f2   :  { %2918 = vmatpush3.bf16.msra.mxu0 %v3207_v36  ;;  %v1032_v36 = vpack.c.bf16 %v3822_v6, %v3822_v6 }
 0x3f3   :  { %2919 = vmatprep.subr.bf16.mxu0 %v3210_v37 }
 0x3f4   :  { %2898 = vmatpush3.bf16.msra.mxu1 %v3209_v38  ;;  %v1322_v38 = vld [vmem:[%s4097_s7] sm:$0xff] }
 0x3f5   :  { %2899 = vmatprep.subr.bf16.mxu1 %v3212_v39 }
 0x3f6   :  { %2920 = vmatpush3.bf16.msra.mxu0 %v3211_v40 }
 0x3f7   :  { %2921 = vmatprep.subr.bf16.mxu0 %v3214_v41 }
 0x3f8   :  { %2900 = vmatpush3.bf16.msra.mxu1 %v3213_v42 }
 0x3f9   :  { %2929 = vmatprep.subr.bf16.mxu1 %v3216_v43 }
 0x3fa   :  { %2922 = vmatpush3.bf16.msra.mxu0 %v3215_v44 }
 0x3fb   :  { %2380 = vmatmul.mubr.bf16.vlgmr.msra.gmra.mrb[24].mxu1 %v1024_v46  ;;  %2951 = vmatprep.subr.bf16.mxu0 %v3218_v47 }
 0x3fc   :  { %2930 = vmatpush3.bf16.msra.mxu1 %v3217_v48  ;;  %2459 = vmatprep.mubr.bf16.mxu1 %v1029_v50 }
 0x3fd   :  { %2420 = vmatmul.mubr.bf16.vlgmr.msra.gmra.mrb[52].mxu0 %v1026_v53  ;;  %2931 = vmatprep.subr.bf16.mxu1 %v3220_v51 }
 0x3fe   :  { %2952 = vmatpush3.bf16.msra.mxu0 %v3219_v45  ;;  %2499 = vmatprep.mubr.bf16.mxu0 %v1031_v52 }
 0x3ff   :  { %2953 = vmatprep.subr.bf16.mxu0 %v3222_v54 }
 0x400   :  { %2932 = vmatpush3.bf16.msra.mxu1 %v3221_v55 }
 0x401   :  { %2933 = vmatprep.subr.bf16.mxu1 %v3224_v56 }
 0x402   :  { %2954 = vmatpush3.bf16.msra.mxu0 %v3223_v49 }
 0x403   :  { %2955 = vmatprep.subr.bf16.mxu0 %v3226_v58 }
 0x404   :  { %2934 = vmatpush3.bf16.msra.mxu1 %v3225_v59 }
 0x405   :  { %2935 = vmatprep.subr.bf16.mxu1 %v3228_v60 }
 0x406   :  { %2956 = vmatpush3.bf16.msra.mxu0 %v3227_v62 }
 0x407   :  { %2957 = vmatprep.subr.bf16.mxu0 %v3230_v63 }
 0x408   :  { %2936 = vmatpush3.bf16.msra.mxu1 %v3229_v0 }
 0x409   :  { %2937 = vmatprep.subr.bf16.mxu1 %v3232_v1 }
 0x40a   :  { %2958 = vmatpush3.bf16.msra.mxu0 %v3231_v2 }
 0x40b   :  { %2959 = vmatprep.subr.bf16.mxu0 %v3234_v4 }
 0x40c   :  { %2938 = vmatpush3.bf16.msra.mxu1 %v3233_v5 }
 0x40d   :  { %2939 = vmatprep.subr.bf16.mxu1 %v3236_v7 }
 0x40e   :  { %2960 = vmatpush3.bf16.msra.mxu0 %v3235_v8 }
 0x40f   :  { %2961 = vmatprep.subr.bf16.mxu0 %v3238_v10 }
 0x410   :  { %2940 = vmatpush3.bf16.msra.mxu1 %v3237_v11 }
 0x411   :  { %2941 = vmatprep.subr.bf16.mxu1 %v3240_v12 }
 0x412   :  { %2962 = vmatpush3.bf16.msra.mxu0 %v3239_v3 }
 0x413   :  { %2963 = vmatprep.subr.bf16.mxu0 %v3242_v13 }
 0x414   :  { %2942 = vmatpush3.bf16.msra.mxu1 %v3241_v14 }
 0x415   :  { %2943 = vmatprep.subr.bf16.mxu1 %v3244_v15 }
 0x416   :  { %2964 = vmatpush3.bf16.msra.mxu0 %v3243_v16 }
 0x417   :  { %2965 = vmatprep.subr.bf16.mxu0 %v3246_v17 }
 0x418   :  { %2944 = vmatpush3.bf16.msra.mxu1 %v3245_v18 }
 0x419   :  { %2973 = vmatprep.subr.bf16.mxu1 %v3248_v19 }
 0x41a   :  { %2966 = vmatpush3.bf16.msra.mxu0 %v3247_v20 }
 0x41b   :  { %2460 = vmatmul.mubr.bf16.vlgmr.msra.gmra.mrb[28].mxu1 %v1028_v21 }
 0x41c   :  { %2974 = vmatpush3.bf16.msra.mxu1 %v3249_v22  ;;  %2539 = vmatprep.mubr.bf16.mxu1 %v1033_v23 }
 0x41d   :  { %2500 = vmatmul.mubr.bf16.vlgmr.msra.gmra.mrb[56].mxu0 %v1030_v25  ;;  %2975 = vmatprep.subr.bf16.mxu1 %v3250_v24 }
 0x420   :  { %2976 = vmatpush3.bf16.msra.mxu1 %v3251_v57 }
 0x421   :  { %2977 = vmatprep.subr.bf16.mxu1 %v3252_v9 }
 0x424   :  { %2978 = vmatpush3.bf16.msra.mxu1 %v3253_v26 }
 0x425   :  { %2979 = vmatprep.subr.bf16.mxu1 %v3254_v61 }
 0x428   :  { %2980 = vmatpush3.bf16.msra.mxu1 %v3255_v27 }
 0x429   :  { %2981 = vmatprep.subr.bf16.mxu1 %v3256_v28 }
 0x42c   :  { %2982 = vmatpush3.bf16.msra.mxu1 %v3257_v29 }
 0x42d   :  { %2983 = vmatprep.subr.bf16.mxu1 %v3258_v30 }
 0x430   :  { %2984 = vmatpush3.bf16.msra.mxu1 %v3259_v31 }
 0x431   :  { %2985 = vmatprep.subr.bf16.mxu1 %v3260_v32 }
 0x434   :  { %2986 = vmatpush3.bf16.msra.mxu1 %v3261_v33 }
 0x435   :  { %2987 = vmatprep.subr.bf16.mxu1 %v3262_v34 }
 0x438   :  { %2988 = vmatpush3.bf16.msra.mxu1 %v3263_v35 }
 0x43b   :  { %2540 = vmatmul.mubr.bf16.vlgmr.msra.gmra.mrb[32].mxu1 %v1032_v36 }
 0x48e   :  { %v2813_v37 = vpop.f32.mrb[16].mxu1 }
 0x48f   :  { %v2814_v39 = vpop.f32.mrb[17].mxu1 }
 0x490   :  { %v2815_v40 = vadd.f32 %v2814_v39, %v2813_v37  ;;  %v2816_v41 = vpop.f32.mrb[18].mxu1  ;;  %v2835_v42 = vpop.f32.mrb[44].mxu0 }
 0x491   :  { %v2817_v43 = vpop.f32.mrb[19].mxu1  ;;  %v2836_v44 = vpop.f32.mrb[45].mxu0 }
 0x492   :  { %v2222_v46 = vadd.f32 %v2815_v40, %v1322_v38  ;;  %v2837_v47 = vadd.f32 %v2836_v44, %v2835_v42  ;;  %v2838_v48 = vpop.f32.mrb[46].mxu0 }
 0x493   :  { %v2839_v50 = vpop.f32.mrb[47].mxu0 }
 0x494   :  { %v2262_v51 = vadd.f32 %v2837_v47, %v2222_v46 }
 0x4ae   :  { %v2857_v45 = vpop.f32.mrb[20].mxu1 }
 0x4af   :  { %v2858_v52 = vpop.f32.mrb[21].mxu1 }
 0x4b0   :  { %v2859_v6 = vadd.f32 %v2858_v52, %v2857_v45  ;;  %v2879_v53 = vpop.f32.mrb[48].mxu0  ;;  %v2860_v54 = vpop.f32.mrb[22].mxu1 }
 0x4b1   :  { %v2880_v55 = vpop.f32.mrb[49].mxu0  ;;  %v2861_v56 = vpop.f32.mrb[23].mxu1 }
 0x4b2   :  { %v2302_v49 = vadd.f32 %v2859_v6, %v2262_v51  ;;  %v2881_v58 = vadd.f32 %v2880_v55, %v2879_v53  ;;  %v2882_v59 = vpop.f32.mrb[50].mxu0 }
 0x4b3   :  { %v2883_v60 = vpop.f32.mrb[51].mxu0 }
 0x4b4   :  { %v2342_v62 = vadd.f32 %v2881_v58, %v2302_v49 }
 0x4ce   :  { %v2901_v63 = vpop.f32.mrb[24].mxu1 }
 0x4cf   :  { %v2902_v0 = vpop.f32.mrb[25].mxu1 }
 0x4d0   :  { %v2903_v1 = vadd.f32 %v2902_v0, %v2901_v63  ;;  %v2923_v2 = vpop.f32.mrb[52].mxu0  ;;  %v2904_v4 = vpop.f32.mrb[26].mxu1 }
 0x4d1   :  { %v2924_v5 = vpop.f32.mrb[53].mxu0  ;;  %v2905_v7 = vpop.f32.mrb[27].mxu1 }
 0x4d2   :  { %v2382_v8 = vadd.f32 %v2903_v1, %v2342_v62  ;;  %v2925_v10 = vadd.f32 %v2924_v5, %v2923_v2  ;;  %v2926_v11 = vpop.f32.mrb[54].mxu0 }
 0x4d3   :  { %v2927_v12 = vpop.f32.mrb[55].mxu0 }
 0x4d4   :  { %v2422_v3 = vadd.f32 %v2925_v10, %v2382_v8 }
 0x4ee   :  { %v2945_v13 = vpop.f32.mrb[28].mxu1 }
 0x4ef   :  { %v2946_v14 = vpop.f32.mrb[29].mxu1 }
 0x4f0   :  { %v2947_v15 = vadd.f32 %v2946_v14, %v2945_v13  ;;  %v2967_v16 = vpop.f32.mrb[56].mxu0  ;;  %v2948_v17 = vpop.f32.mrb[30].mxu1 }
 0x4f1   :  { %v2968_v18 = vpop.f32.mrb[57].mxu0  ;;  %v2949_v19 = vpop.f32.mrb[31].mxu1 }
 0x4f2   :  { %v2462_v20 = vadd.f32 %v2947_v15, %v2422_v3  ;;  %v2969_v21 = vadd.f32 %v2968_v18, %v2967_v16  ;;  %v2970_v22 = vpop.f32.mrb[58].mxu0 }
 0x4f3   :  { %v2971_v23 = vpop.f32.mrb[59].mxu0 }
 0x4f4   :  { %v2502_v24 = vadd.f32 %v2969_v21, %v2462_v20 }
 0x50e   :  { %v2989_v25 = vpop.f32.mrb[32].mxu1 }
 0x50f   :  { %v2990_v57 = vpop.f32.mrb[33].mxu1 }
 0x510   :  { %v2991_v9 = vadd.f32 %v2990_v57, %v2989_v25  ;;  %v2992_v26 = vpop.f32.mrb[34].mxu1 }
 0x511   :  { %v2993_v61 = vpop.f32.mrb[35].mxu1 }
 0x512   :  { %v2542_v27 = vadd.f32 %v2991_v9, %v2502_v24 }
 0x514   :  { %v2547_v28 = vmax.f32 %v2542_v27, 0.0 }
 0x516   :  { %2548 = vst.msk [vmem:[%s4098_s8] sm:$0xff] %vm805_vm4, %v2547_v28 }

</bundles_post_ra>
